<compile_context>
chip_gen: v7x
topology: tpu7x:2x2x1
jax: 0.10.0
libtpu: 0.0.40
codegen_flags: <defaults>
</compile_context>

<pallas_src>
import functools

import jax
import jax.numpy as jnp
from jax.experimental import pallas as pl
from jax.experimental.pallas import tpu as pltpu


def _elu(v):
    # ELU (alpha=1); negative branch clamped before exp (numerically safe).
    # (expm1 would be marginally more accurate for tiny |v|; exp-1 in f32 is
    # within ~1e-7 absolute and has guaranteed Mosaic lowering.)
    return jnp.where(v > 0.0, v, jnp.exp(jnp.minimum(v, 0.0)) - 1.0)


def _encoder_kernel(x_ref, w_ref, bc_ref, sp_ref, ft_ref, br_ref, o_ref, core_ref,
                    *, b_tile, c_out, f_len, tap_offsets, offset):
    # x_ref   : (b_tile, C_in, PW) bf16  raw input, 1px-padded, (Hp*Wp) flattened
    # w_ref   : (C_out, K=9*C_in)  bf16  fused conv weights, K = tap*C_in + c
    # bc_ref  : (C_out, 1)         f32   conv bias
    # sp_ref  : (F, TN)            bf16  spatial masks (width-padded flat layout,
    #                                    zeros at pad columns), current N tile
    # ft_ref  : (C_out, TN)        f32   feature weights block
    # br_ref  : (1, TN)            f32   readout bias block
    # o_ref   : (b_tile, TN)       f32   output block (dense sublane x lane)
    # core_ref: (b_tile*C_out, F)  f32   scratch: batch-major core activations,
    #                                    computed once per batch tile, reused
    #                                    across all N tiles.

    # ---- core (3x3 conv + bias + ELU): only on the first N tile ----
    @pl.when(pl.program_id(1) == 0)
    def _():
        xp = x_ref[...]                                          # (b_tile, C_in, PW)
        # In-kernel im2col: each 3x3 tap is a static lane-offset window of the
        # width-padded flattened input.  Garbage values at the pad columns are
        # multiplied by the zero rows of sp_ref later, so they never contribute.
        xcol = jnp.concatenate(
            [xp[:, :, off:off + f_len] for off in tap_offsets], axis=1)  # (b_tile, K, F)
        w = w_ref[...]
        bc = bc_ref[...]
        for b in range(b_tile):   # one fused K=9*C_in MXU matmul per batch element
            z = jnp.dot(w, xcol[b], preferred_element_type=jnp.float32)  # (C_out, F)
            core_ref[b * c_out:(b + 1) * c_out, :] = _elu(z + bc)

    # ---- factorized readout + EncoderShifter tail for this N tile ----
    # ONE (b_tile*C_out, F) @ (F, TN) matmul (M = b_tile*C_out).
    pooled = jnp.dot(core_ref[...].astype(jnp.bfloat16), sp_ref[...],
                     preferred_element_type=jnp.float32)         # (b_tile*C_out, TN)
    tn = pooled.shape[-1]
    pooled = pooled.reshape(b_tile, c_out, tn)
    # Grouped sublane reduce against the feature weights (f32 elementwise tail).
    y = jnp.sum(pooled * ft_ref[...][None, :, :], axis=1) + br_ref[...]   # (b_tile, TN)
    o_ref[...] = (_elu(y + offset) + 1.0).astype(o_ref.dtype)    # one dense store


def encoder_shifter_forward(x, params, *, elu_offset, b_tile=8, tn=None):
    """x: (B, C_in, H, W) float32 NCHW. Returns (B, N) float32 neuron responses."""
    w_conv, b_conv, spatial, features, b_ro = params
    B, C_in, H, W = x.shape
    C_out = w_conv.shape[0]
    N = spatial.shape[0]
    Hp, Wp = H + 2, W + 2
    PW = Hp * Wp                      # flattened padded spatial extent
    F = (H - 1) * Wp + W              # tight flattened conv-output window
    K = 9 * C_in
    tap_offsets = tuple(kh * Wp + kw for kh in range(3) for kw in range(3))

    # NOTE(v7x): for real batch sizes keep b_tile small enough that num_bt >= 2
    # so the "parallel" batch axis shards across both TensorCores.
    num_bt = pl.cdiv(B, b_tile)
    B_pad = num_bt * b_tile

    if tn is None:
        tn = min(512, 128 * pl.cdiv(N, 128))   # single N tile for small N
    n_tiles = pl.cdiv(N, tn)
    N_pad = n_tiles * tn

    # --- glue (O(input) HBM only): pad batch + 1px border, flatten, cast bf16 ---
    xb = jnp.pad(x, ((0, B_pad - B), (0, 0), (1, 1), (1, 1)))
    x_flat = xb.reshape(B_pad, C_in, PW).astype(jnp.bfloat16)

    # Conv weights with K ordered as tap*C_in + c (matches the in-kernel concat).
    w_col = jnp.transpose(w_conv, (0, 2, 3, 1)).reshape(C_out, K).astype(jnp.bfloat16)
    bc = b_conv.reshape(C_out, 1).astype(jnp.float32)

    # Spatial masks embedded in the width-padded flat layout (zeros at the two
    # pad columns of every row), transposed to (F, N_pad).
    sp_w = jnp.pad(spatial, ((0, N_pad - N), (0, 0), (0, Wp - W)))       # (N_pad, H, Wp)
    sp_flat = sp_w.reshape(N_pad, H * Wp)[:, :F].T.astype(jnp.bfloat16)  # (F, N_pad)

    ft_t = jnp.pad(features, ((0, N_pad - N), (0, 0))).T.astype(jnp.float32)  # (C_out, N_pad)
    br = jnp.pad(b_ro, (0, N_pad - N)).reshape(1, N_pad).astype(jnp.float32)

    kernel = functools.partial(_encoder_kernel, b_tile=b_tile, c_out=C_out,
                               f_len=F, tap_offsets=tap_offsets,
                               offset=float(elu_offset))

    flops = int(2 * B_pad * C_out * K * F            # conv
                + 2 * B_pad * C_out * F * N_pad      # spatial pooling matmul
                + 2 * B_pad * C_out * N_pad)         # feature contraction
    transcendentals = int(B_pad * C_out * F + B_pad * N_pad)
    bytes_accessed = int(x_flat.size * 2 + w_col.size * 2 + bc.size * 4
                         + (num_bt if n_tiles > 1 else 1)
                         * (sp_flat.size * 2 + ft_t.size * 4 + br.size * 4)
                         + B_pad * N_pad * 4)
    cost = pl.CostEstimate(flops=flops, transcendentals=transcendentals,
                           bytes_accessed=bytes_accessed)

    out = pl.pallas_call(
        kernel,
        out_shape=jax.ShapeDtypeStruct((B_pad, N_pad), jnp.float32),
        grid_spec=pltpu.PrefetchScalarGridSpec(
            num_scalar_prefetch=0,
            grid=(num_bt, n_tiles),
            in_specs=[
                pl.BlockSpec((b_tile, C_in, PW), lambda i, j: (i, 0, 0)),
                pl.BlockSpec((C_out, K), lambda i, j: (0, 0)),
                pl.BlockSpec((C_out, 1), lambda i, j: (0, 0)),
                pl.BlockSpec((F, tn), lambda i, j: (0, j)),
                pl.BlockSpec((C_out, tn), lambda i, j: (0, j)),
                pl.BlockSpec((1, tn), lambda i, j: (0, j)),
            ],
            out_specs=pl.BlockSpec((b_tile, tn), lambda i, j: (i, j)),
            scratch_shapes=[pltpu.VMEM((b_tile * C_out, F), jnp.float32)],
        ),
        compiler_params=pltpu.CompilerParams(
            dimension_semantics=("parallel", "arbitrary"),
            vmem_limit_bytes=32 * 1024 * 1024),
        cost_estimate=cost,
    )(x_flat, w_col, bc, sp_flat, ft_t, br)

    return out[:B, :N]


def _reference(x, params, *, elu_offset):
    w_conv, b_conv, spatial, features, b_ro = params
    z = jax.lax.conv_general_dilated(
        x, w_conv, window_strides=(1, 1), padding="SAME",
        dimension_numbers=("NCHW", "OIHW", "NCHW"))
    core = jax.nn.elu(z + b_conv[None, :, None, None])
    pooled = jnp.einsum("bchw,nhw->bcn", core, spatial)
    y = jnp.einsum("bcn,nc->bn", pooled, features) + b_ro[None, :]
    return jax.nn.elu(y + elu_offset) + 1.0


if __name__ == "__main__":
    B, C_in, H, W = 2, 4, 16, 16
    C_out, N = 8, 16
    elu_offset = 0.1

    key = jax.random.PRNGKey(0)
    kx, kw, kb, ks, kf, kr = jax.random.split(key, 6)
    x = jax.random.normal(kx, (B, C_in, H, W), dtype=jnp.float32)
    w_conv = 0.1 * jax.random.normal(kw, (C_out, C_in, 3, 3), dtype=jnp.float32)
    b_conv = 0.1 * jax.random.normal(kb, (C_out,), dtype=jnp.float32)
    spatial = 0.05 * jax.random.normal(ks, (N, H, W), dtype=jnp.float32)
    features = 0.2 * jax.random.normal(kf, (N, C_out), dtype=jnp.float32)
    b_ro = 0.1 * jax.random.normal(kr, (N,), dtype=jnp.float32)
    params = (w_conv, b_conv, spatial, features, b_ro)

    # TODO(synk): the stored `shifter` submodule is never invoked in this forward
    # signature (no eye-position shift reaches the readout), so it has no kernel
    # equivalent.
    out = encoder_shifter_forward(x, params, elu_offset=elu_offset)
    out = jax.block_until_ready(out)

    ref = _reference(x, params, elu_offset=elu_offset)
    assert out.shape == (B, N)
    assert jnp.allclose(out, ref, atol=2e-2, rtol=2e-2), (out, ref)
    print("KERNEL_OK")
</pallas_src>

<mosaic_0001>
module attributes {stable_mosaic.version = 11 : i64} {
  func.func @_encoder_kernel(%arg0: i32, %arg1: i32, %arg2: memref<8x4x324xbf16, #tpu.memory_space<vmem>>, %arg3: memref<8x36xbf16, #tpu.memory_space<vmem>>, %arg4: memref<8x1xf32, #tpu.memory_space<vmem>>, %arg5: memref<286x128xbf16, #tpu.memory_space<vmem>>, %arg6: memref<8x128xf32, #tpu.memory_space<vmem>>, %arg7: memref<1x128xf32, #tpu.memory_space<vmem>>, %arg8: memref<8x128xf32, #tpu.memory_space<vmem>>, %arg9: memref<64x286xf32, #tpu.memory_space<vmem>>) attributes {dimension_semantics = [#tpu.dimension_semantics<parallel>, #tpu.dimension_semantics<arbitrary>], iteration_bounds = array<i64: 1, 1>, scalar_prefetch = 0 : i64, scratch_operands = 1 : i64, tpu.core_type = #tpu.core_type<tc>, window_params = [{transform_indices = @transform_0, window_bounds = array<i64: 8, 4, 324>}, {pipeline_mode = #tpu.pipeline_mode<synchronous>, transform_indices = @transform_1, window_bounds = array<i64: 8, 36>}, {pipeline_mode = #tpu.pipeline_mode<synchronous>, transform_indices = @transform_2, window_bounds = array<i64: 8, 1>}, {transform_indices = @transform_3, window_bounds = array<i64: 286, 128>}, {transform_indices = @transform_4, window_bounds = array<i64: 8, 128>}, {transform_indices = @transform_5, window_bounds = array<i64: 1, 128>}, {transform_indices = @transform_6, window_bounds = array<i64: 8, 128>}]} {
    %c0_i32 = arith.constant 0 : i32
    %0 = arith.cmpi eq, %arg1, %c0_i32 : i32
    %1 = arith.extui %0 : i1 to i32
    %c0_i32_0 = arith.constant 0 : i32
    %2 = arith.cmpi ne, %1, %c0_i32_0 : i32
    scf.if %2 {
      %c0_16 = arith.constant 0 : index
      %c0_17 = arith.constant 0 : index
      %c0_18 = arith.constant 0 : index
      %29 = vector.load %arg2[%c0_16, %c0_17, %c0_18] : memref<8x4x324xbf16, #tpu.memory_space<vmem>>, vector<8x4x324xbf16>
      %30 = vector.extract_strided_slice %29 {offsets = [0, 0, 0], sizes = [8, 4, 286], strides = [1, 1, 1]} : vector<8x4x324xbf16> to vector<8x4x286xbf16>
      %31 = vector.extract_strided_slice %29 {offsets = [0, 0, 1], sizes = [8, 4, 286], strides = [1, 1, 1]} : vector<8x4x324xbf16> to vector<8x4x286xbf16>
      %32 = vector.extract_strided_slice %29 {offsets = [0, 0, 2], sizes = [8, 4, 286], strides = [1, 1, 1]} : vector<8x4x324xbf16> to vector<8x4x286xbf16>
      %33 = vector.extract_strided_slice %29 {offsets = [0, 0, 18], sizes = [8, 4, 286], strides = [1, 1, 1]} : vector<8x4x324xbf16> to vector<8x4x286xbf16>
      %34 = vector.extract_strided_slice %29 {offsets = [0, 0, 19], sizes = [8, 4, 286], strides = [1, 1, 1]} : vector<8x4x324xbf16> to vector<8x4x286xbf16>
      %35 = vector.extract_strided_slice %29 {offsets = [0, 0, 20], sizes = [8, 4, 286], strides = [1, 1, 1]} : vector<8x4x324xbf16> to vector<8x4x286xbf16>
      %36 = vector.extract_strided_slice %29 {offsets = [0, 0, 36], sizes = [8, 4, 286], strides = [1, 1, 1]} : vector<8x4x324xbf16> to vector<8x4x286xbf16>
      %37 = vector.extract_strided_slice %29 {offsets = [0, 0, 37], sizes = [8, 4, 286], strides = [1, 1, 1]} : vector<8x4x324xbf16> to vector<8x4x286xbf16>
      %38 = vector.extract_strided_slice %29 {offsets = [0, 0, 38], sizes = [8, 4, 286], strides = [1, 1, 1]} : vector<8x4x324xbf16> to vector<8x4x286xbf16>
      %39 = tpu.concatenate %30, %31, %32, %33, %34, %35, %36, %37, %38 in 1 : vector<8x4x286xbf16>, vector<8x4x286xbf16>, vector<8x4x286xbf16>, vector<8x4x286xbf16>, vector<8x4x286xbf16>, vector<8x4x286xbf16>, vector<8x4x286xbf16>, vector<8x4x286xbf16>, vector<8x4x286xbf16> -> vector<8x36x286xbf16>
      %c0_19 = arith.constant 0 : index
      %c0_20 = arith.constant 0 : index
      %40 = vector.load %arg3[%c0_19, %c0_20] : memref<8x36xbf16, #tpu.memory_space<vmem>>, vector<8x36xbf16>
      %c0_21 = arith.constant 0 : index
      %c0_22 = arith.constant 0 : index
      %41 = vector.load %arg4[%c0_21, %c0_22] : memref<8x1xf32, #tpu.memory_space<vmem>>, vector<8x1xf32>
      %42 = vector.extract_strided_slice %39 {offsets = [0, 0, 0], sizes = [1, 36, 286], strides = [1, 1, 1]} : vector<8x36x286xbf16> to vector<1x36x286xbf16>
      %43 = vector.shape_cast %42 : vector<1x36x286xbf16> to vector<36x286xbf16>
      %cst_23 = arith.constant dense<0.000000e+00> : vector<8x286xf32>
      %44 = tpu.matmul %40, %43, %cst_23 {dimension_numbers = #tpu.dot_dimension_numbers<[1], [0], [0], [1], [0, 0, 1, 1], [], []>} : vector<8x36xbf16>, vector<36x286xbf16>, vector<8x286xf32> -> vector<8x286xf32>
      %45 = vector.broadcast %41 : vector<8x1xf32> to vector<8x286xf32>
      %46 = arith.addf %44, %45 : vector<8x286xf32>
      %cst_24 = arith.constant 0.000000e+00 : f32
      %47 = vector.broadcast %cst_24 : f32 to vector<8x286xf32>
      %48 = arith.cmpf ogt, %46, %47 : vector<8x286xf32>
      %cst_25 = arith.constant 0.000000e+00 : f32
      %49 = vector.broadcast %cst_25 : f32 to vector<8x286xf32>
      %50 = arith.minimumf %46, %49 : vector<8x286xf32>
      %51 = math.exp %50 : vector<8x286xf32>
      %cst_26 = arith.constant 1.000000e+00 : f32
      %52 = vector.broadcast %cst_26 : f32 to vector<8x286xf32>
      %53 = arith.subf %51, %52 : vector<8x286xf32>
      %54 = arith.select %48, %46, %53 : vector<8x286xi1>, vector<8x286xf32>
      %c0_27 = arith.constant 0 : index
      %c0_28 = arith.constant 0 : index
      %55 = vector.load %arg9[%c0_27, %c0_28] : memref<64x286xf32, #tpu.memory_space<vmem>>, vector<8x286xf32>
      tpu.vector_store %arg9[%c0_27, %c0_28], %54 {strides = array<i32>} : memref<64x286xf32, #tpu.memory_space<vmem>>, vector<8x286xf32>,
      %56 = vector.extract_strided_slice %39 {offsets = [1, 0, 0], sizes = [1, 36, 286], strides = [1, 1, 1]} : vector<8x36x286xbf16> to vector<1x36x286xbf16>
      %57 = vector.shape_cast %56 : vector<1x36x286xbf16> to vector<36x286xbf16>
      %cst_29 = arith.constant dense<0.000000e+00> : vector<8x286xf32>
      %58 = tpu.matmul %40, %57, %cst_29 {dimension_numbers = #tpu.dot_dimension_numbers<[1], [0], [0], [1], [0, 0, 1, 1], [], []>} : vector<8x36xbf16>, vector<36x286xbf16>, vector<8x286xf32> -> vector<8x286xf32>
      %59 = vector.broadcast %41 : vector<8x1xf32> to vector<8x286xf32>
      %60 = arith.addf %58, %59 : vector<8x286xf32>
      %cst_30 = arith.constant 0.000000e+00 : f32
      %61 = vector.broadcast %cst_30 : f32 to vector<8x286xf32>
      %62 = arith.cmpf ogt, %60, %61 : vector<8x286xf32>
      %cst_31 = arith.constant 0.000000e+00 : f32
      %63 = vector.broadcast %cst_31 : f32 to vector<8x286xf32>
      %64 = arith.minimumf %60, %63 : vector<8x286xf32>
      %65 = math.exp %64 : vector<8x286xf32>
      %cst_32 = arith.constant 1.000000e+00 : f32
      %66 = vector.broadcast %cst_32 : f32 to vector<8x286xf32>
      %67 = arith.subf %65, %66 : vector<8x286xf32>
      %68 = arith.select %62, %60, %67 : vector<8x286xi1>, vector<8x286xf32>
      %c8 = arith.constant 8 : index
      %c0_33 = arith.constant 0 : index
      %69 = vector.load %arg9[%c8, %c0_33] : memref<64x286xf32, #tpu.memory_space<vmem>>, vector<8x286xf32>
      tpu.vector_store %arg9[%c8, %c0_33], %68 {strides = array<i32>} : memref<64x286xf32, #tpu.memory_space<vmem>>, vector<8x286xf32>,
      %70 = vector.extract_strided_slice %39 {offsets = [2, 0, 0], sizes = [1, 36, 286], strides = [1, 1, 1]} : vector<8x36x286xbf16> to vector<1x36x286xbf16>
      %71 = vector.shape_cast %70 : vector<1x36x286xbf16> to vector<36x286xbf16>
      %cst_34 = arith.constant dense<0.000000e+00> : vector<8x286xf32>
      %72 = tpu.matmul %40, %71, %cst_34 {dimension_numbers = #tpu.dot_dimension_numbers<[1], [0], [0], [1], [0, 0, 1, 1], [], []>} : vector<8x36xbf16>, vector<36x286xbf16>, vector<8x286xf32> -> vector<8x286xf32>
      %73 = vector.broadcast %41 : vector<8x1xf32> to vector<8x286xf32>
      %74 = arith.addf %72, %73 : vector<8x286xf32>
      %cst_35 = arith.constant 0.000000e+00 : f32
      %75 = vector.broadcast %cst_35 : f32 to vector<8x286xf32>
      %76 = arith.cmpf ogt, %74, %75 : vector<8x286xf32>
      %cst_36 = arith.constant 0.000000e+00 : f32
      %77 = vector.broadcast %cst_36 : f32 to vector<8x286xf32>
      %78 = arith.minimumf %74, %77 : vector<8x286xf32>
      %79 = math.exp %78 : vector<8x286xf32>
      %cst_37 = arith.constant 1.000000e+00 : f32
      %80 = vector.broadcast %cst_37 : f32 to vector<8x286xf32>
      %81 = arith.subf %79, %80 : vector<8x286xf32>
      %82 = arith.select %76, %74, %81 : vector<8x286xi1>, vector<8x286xf32>
      %c16 = arith.constant 16 : index
      %c0_38 = arith.constant 0 : index
      %83 = vector.load %arg9[%c16, %c0_38] : memref<64x286xf32, #tpu.memory_space<vmem>>, vector<8x286xf32>
      tpu.vector_store %arg9[%c16, %c0_38], %82 {strides = array<i32>} : memref<64x286xf32, #tpu.memory_space<vmem>>, vector<8x286xf32>,
      %84 = vector.extract_strided_slice %39 {offsets = [3, 0, 0], sizes = [1, 36, 286], strides = [1, 1, 1]} : vector<8x36x286xbf16> to vector<1x36x286xbf16>
      %85 = vector.shape_cast %84 : vector<1x36x286xbf16> to vector<36x286xbf16>
      %cst_39 = arith.constant dense<0.000000e+00> : vector<8x286xf32>
      %86 = tpu.matmul %40, %85, %cst_39 {dimension_numbers = #tpu.dot_dimension_numbers<[1], [0], [0], [1], [0, 0, 1, 1], [], []>} : vector<8x36xbf16>, vector<36x286xbf16>, vector<8x286xf32> -> vector<8x286xf32>
      %87 = vector.broadcast %41 : vector<8x1xf32> to vector<8x286xf32>
      %88 = arith.addf %86, %87 : vector<8x286xf32>
      %cst_40 = arith.constant 0.000000e+00 : f32
      %89 = vector.broadcast %cst_40 : f32 to vector<8x286xf32>
      %90 = arith.cmpf ogt, %88, %89 : vector<8x286xf32>
      %cst_41 = arith.constant 0.000000e+00 : f32
      %91 = vector.broadcast %cst_41 : f32 to vector<8x286xf32>
      %92 = arith.minimumf %88, %91 : vector<8x286xf32>
      %93 = math.exp %92 : vector<8x286xf32>
      %cst_42 = arith.constant 1.000000e+00 : f32
      %94 = vector.broadcast %cst_42 : f32 to vector<8x286xf32>
      %95 = arith.subf %93, %94 : vector<8x286xf32>
      %96 = arith.select %90, %88, %95 : vector<8x286xi1>, vector<8x286xf32>
      %c24 = arith.constant 24 : index
      %c0_43 = arith.constant 0 : index
      %97 = vector.load %arg9[%c24, %c0_43] : memref<64x286xf32, #tpu.memory_space<vmem>>, vector<8x286xf32>
      tpu.vector_store %arg9[%c24, %c0_43], %96 {strides = array<i32>} : memref<64x286xf32, #tpu.memory_space<vmem>>, vector<8x286xf32>,
      %98 = vector.extract_strided_slice %39 {offsets = [4, 0, 0], sizes = [1, 36, 286], strides = [1, 1, 1]} : vector<8x36x286xbf16> to vector<1x36x286xbf16>
      %99 = vector.shape_cast %98 : vector<1x36x286xbf16> to vector<36x286xbf16>
      %cst_44 = arith.constant dense<0.000000e+00> : vector<8x286xf32>
      %100 = tpu.matmul %40, %99, %cst_44 {dimension_numbers = #tpu.dot_dimension_numbers<[1], [0], [0], [1], [0, 0, 1, 1], [], []>} : vector<8x36xbf16>, vector<36x286xbf16>, vector<8x286xf32> -> vector<8x286xf32>
      %101 = vector.broadcast %41 : vector<8x1xf32> to vector<8x286xf32>
      %102 = arith.addf %100, %101 : vector<8x286xf32>
      %cst_45 = arith.constant 0.000000e+00 : f32
      %103 = vector.broadcast %cst_45 : f32 to vector<8x286xf32>
      %104 = arith.cmpf ogt, %102, %103 : vector<8x286xf32>
      %cst_46 = arith.constant 0.000000e+00 : f32
      %105 = vector.broadcast %cst_46 : f32 to vector<8x286xf32>
      %106 = arith.minimumf %102, %105 : vector<8x286xf32>
      %107 = math.exp %106 : vector<8x286xf32>
      %cst_47 = arith.constant 1.000000e+00 : f32
      %108 = vector.broadcast %cst_47 : f32 to vector<8x286xf32>
      %109 = arith.subf %107, %108 : vector<8x286xf32>
      %110 = arith.select %104, %102, %109 : vector<8x286xi1>, vector<8x286xf32>
      %c32 = arith.constant 32 : index
      %c0_48 = arith.constant 0 : index
      %111 = vector.load %arg9[%c32, %c0_48] : memref<64x286xf32, #tpu.memory_space<vmem>>, vector<8x286xf32>
      tpu.vector_store %arg9[%c32, %c0_48], %110 {strides = array<i32>} : memref<64x286xf32, #tpu.memory_space<vmem>>, vector<8x286xf32>,
      %112 = vector.extract_strided_slice %39 {offsets = [5, 0, 0], sizes = [1, 36, 286], strides = [1, 1, 1]} : vector<8x36x286xbf16> to vector<1x36x286xbf16>
      %113 = vector.shape_cast %112 : vector<1x36x286xbf16> to vector<36x286xbf16>
      %cst_49 = arith.constant dense<0.000000e+00> : vector<8x286xf32>
      %114 = tpu.matmul %40, %113, %cst_49 {dimension_numbers = #tpu.dot_dimension_numbers<[1], [0], [0], [1], [0, 0, 1, 1], [], []>} : vector<8x36xbf16>, vector<36x286xbf16>, vector<8x286xf32> -> vector<8x286xf32>
      %115 = vector.broadcast %41 : vector<8x1xf32> to vector<8x286xf32>
      %116 = arith.addf %114, %115 : vector<8x286xf32>
      %cst_50 = arith.constant 0.000000e+00 : f32
      %117 = vector.broadcast %cst_50 : f32 to vector<8x286xf32>
      %118 = arith.cmpf ogt, %116, %117 : vector<8x286xf32>
      %cst_51 = arith.constant 0.000000e+00 : f32
      %119 = vector.broadcast %cst_51 : f32 to vector<8x286xf32>
      %120 = arith.minimumf %116, %119 : vector<8x286xf32>
      %121 = math.exp %120 : vector<8x286xf32>
      %cst_52 = arith.constant 1.000000e+00 : f32
      %122 = vector.broadcast %cst_52 : f32 to vector<8x286xf32>
      %123 = arith.subf %121, %122 : vector<8x286xf32>
      %124 = arith.select %118, %116, %123 : vector<8x286xi1>, vector<8x286xf32>
      %c40 = arith.constant 40 : index
      %c0_53 = arith.constant 0 : index
      %125 = vector.load %arg9[%c40, %c0_53] : memref<64x286xf32, #tpu.memory_space<vmem>>, vector<8x286xf32>
      tpu.vector_store %arg9[%c40, %c0_53], %124 {strides = array<i32>} : memref<64x286xf32, #tpu.memory_space<vmem>>, vector<8x286xf32>,
      %126 = vector.extract_strided_slice %39 {offsets = [6, 0, 0], sizes = [1, 36, 286], strides = [1, 1, 1]} : vector<8x36x286xbf16> to vector<1x36x286xbf16>
      %127 = vector.shape_cast %126 : vector<1x36x286xbf16> to vector<36x286xbf16>
      %cst_54 = arith.constant dense<0.000000e+00> : vector<8x286xf32>
      %128 = tpu.matmul %40, %127, %cst_54 {dimension_numbers = #tpu.dot_dimension_numbers<[1], [0], [0], [1], [0, 0, 1, 1], [], []>} : vector<8x36xbf16>, vector<36x286xbf16>, vector<8x286xf32> -> vector<8x286xf32>
      %129 = vector.broadcast %41 : vector<8x1xf32> to vector<8x286xf32>
      %130 = arith.addf %128, %129 : vector<8x286xf32>
      %cst_55 = arith.constant 0.000000e+00 : f32
      %131 = vector.broadcast %cst_55 : f32 to vector<8x286xf32>
      %132 = arith.cmpf ogt, %130, %131 : vector<8x286xf32>
      %cst_56 = arith.constant 0.000000e+00 : f32
      %133 = vector.broadcast %cst_56 : f32 to vector<8x286xf32>
      %134 = arith.minimumf %130, %133 : vector<8x286xf32>
      %135 = math.exp %134 : vector<8x286xf32>
      %cst_57 = arith.constant 1.000000e+00 : f32
      %136 = vector.broadcast %cst_57 : f32 to vector<8x286xf32>
      %137 = arith.subf %135, %136 : vector<8x286xf32>
      %138 = arith.select %132, %130, %137 : vector<8x286xi1>, vector<8x286xf32>
      %c48 = arith.constant 48 : index
      %c0_58 = arith.constant 0 : index
      %139 = vector.load %arg9[%c48, %c0_58] : memref<64x286xf32, #tpu.memory_space<vmem>>, vector<8x286xf32>
      tpu.vector_store %arg9[%c48, %c0_58], %138 {strides = array<i32>} : memref<64x286xf32, #tpu.memory_space<vmem>>, vector<8x286xf32>,
      %140 = vector.extract_strided_slice %39 {offsets = [7, 0, 0], sizes = [1, 36, 286], strides = [1, 1, 1]} : vector<8x36x286xbf16> to vector<1x36x286xbf16>
      %141 = vector.shape_cast %140 : vector<1x36x286xbf16> to vector<36x286xbf16>
      %cst_59 = arith.constant dense<0.000000e+00> : vector<8x286xf32>
      %142 = tpu.matmul %40, %141, %cst_59 {dimension_numbers = #tpu.dot_dimension_numbers<[1], [0], [0], [1], [0, 0, 1, 1], [], []>} : vector<8x36xbf16>, vector<36x286xbf16>, vector<8x286xf32> -> vector<8x286xf32>
      %143 = vector.broadcast %41 : vector<8x1xf32> to vector<8x286xf32>
      %144 = arith.addf %142, %143 : vector<8x286xf32>
      %cst_60 = arith.constant 0.000000e+00 : f32
      %145 = vector.broadcast %cst_60 : f32 to vector<8x286xf32>
      %146 = arith.cmpf ogt, %144, %145 : vector<8x286xf32>
      %cst_61 = arith.constant 0.000000e+00 : f32
      %147 = vector.broadcast %cst_61 : f32 to vector<8x286xf32>
      %148 = arith.minimumf %144, %147 : vector<8x286xf32>
      %149 = math.exp %148 : vector<8x286xf32>
      %cst_62 = arith.constant 1.000000e+00 : f32
      %150 = vector.broadcast %cst_62 : f32 to vector<8x286xf32>
      %151 = arith.subf %149, %150 : vector<8x286xf32>
      %152 = arith.select %146, %144, %151 : vector<8x286xi1>, vector<8x286xf32>
      %c56 = arith.constant 56 : index
      %c0_63 = arith.constant 0 : index
      %153 = vector.load %arg9[%c56, %c0_63] : memref<64x286xf32, #tpu.memory_space<vmem>>, vector<8x286xf32>
      tpu.vector_store %arg9[%c56, %c0_63], %152 {strides = array<i32>} : memref<64x286xf32, #tpu.memory_space<vmem>>, vector<8x286xf32>,
    } else {
    }
    %c0 = arith.constant 0 : index
    %c0_1 = arith.constant 0 : index
    %3 = vector.load %arg9[%c0, %c0_1] : memref<64x286xf32, #tpu.memory_space<vmem>>, vector<64x286xf32>
    %4 = arith.truncf %3 : vector<64x286xf32> to vector<64x286xbf16>
    %c0_2 = arith.constant 0 : index
    %c0_3 = arith.constant 0 : index
    %5 = vector.load %arg5[%c0_2, %c0_3] : memref<286x128xbf16, #tpu.memory_space<vmem>>, vector<286x128xbf16>
    %cst = arith.constant dense<0.000000e+00> : vector<64x128xf32>
    %6 = tpu.matmul %4, %5, %cst {dimension_numbers = #tpu.dot_dimension_numbers<[1], [0], [0], [1], [0, 0, 1, 1], [], []>} : vector<64x286xbf16>, vector<286x128xbf16>, vector<64x128xf32> -> vector<64x128xf32>
    %7 = vector.shape_cast %6 : vector<64x128xf32> to vector<8x8x128xf32>
    %c0_4 = arith.constant 0 : index
    %c0_5 = arith.constant 0 : index
    %8 = vector.load %arg6[%c0_4, %c0_5] : memref<8x128xf32, #tpu.memory_space<vmem>>, vector<8x128xf32>
    %9 = vector.shape_cast %8 : vector<8x128xf32> to vector<1x8x128xf32>
    %10 = vector.broadcast %9 : vector<1x8x128xf32> to vector<8x8x128xf32>
    %11 = arith.mulf %7, %10 : vector<8x8x128xf32>
    %cst_6 = arith.constant dense<0.000000e+00> : vector<8x128xf32>
    %12 = vector.multi_reduction <add>, %11, %cst_6 [1] : vector<8x8x128xf32> to vector<8x128xf32>
    %c0_7 = arith.constant 0 : index
    %c0_8 = arith.constant 0 : index
    %13 = vector.load %arg7[%c0_7, %c0_8] : memref<1x128xf32, #tpu.memory_space<vmem>>, vector<1x128xf32>
    %14 = vector.broadcast %13 : vector<1x128xf32> to vector<8x128xf32>
    %15 = arith.addf %12, %14 : vector<8x128xf32>
    %cst_9 = arith.constant 1.000000e-01 : f32
    %16 = vector.broadcast %cst_9 : f32 to vector<8x128xf32>
    %17 = arith.addf %15, %16 : vector<8x128xf32>
    %cst_10 = arith.constant 0.000000e+00 : f32
    %18 = vector.broadcast %cst_10 : f32 to vector<8x128xf32>
    %19 = arith.cmpf ogt, %17, %18 : vector<8x128xf32>
    %cst_11 = arith.constant 0.000000e+00 : f32
    %20 = vector.broadcast %cst_11 : f32 to vector<8x128xf32>
    %21 = arith.minimumf %17, %20 : vector<8x128xf32>
    %22 = math.exp %21 : vector<8x128xf32>
    %cst_12 = arith.constant 1.000000e+00 : f32
    %23 = vector.broadcast %cst_12 : f32 to vector<8x128xf32>
    %24 = arith.subf %22, %23 : vector<8x128xf32>
    %25 = arith.select %19, %17, %24 : vector<8x128xi1>, vector<8x128xf32>
    %cst_13 = arith.constant 1.000000e+00 : f32
    %26 = vector.broadcast %cst_13 : f32 to vector<8x128xf32>
    %27 = arith.addf %25, %26 : vector<8x128xf32>
    %c0_14 = arith.constant 0 : index
    %c0_15 = arith.constant 0 : index
    %28 = vector.load %arg8[%c0_14, %c0_15] : memref<8x128xf32, #tpu.memory_space<vmem>>, vector<8x128xf32>
    tpu.vector_store %arg8[%c0_14, %c0_15], %27 {strides = array<i32>} : memref<8x128xf32, #tpu.memory_space<vmem>>, vector<8x128xf32>,
    return
  }
  func.func @transform_0(%arg0: i32, %arg1: i32) -> (i32, i32, i32) {
    %c0_i32 = arith.constant 0 : i32
    %c0_i32_0 = arith.constant 0 : i32
    %c0_i32_1 = arith.constant 0 : i32
    return %arg0, %c0_i32, %c0_i32_0 : i32, i32, i32
  }
  func.func @transform_1(%arg0: i32, %arg1: i32) -> (i32, i32) {
    %c0_i32 = arith.constant 0 : i32
    %c0_i32_0 = arith.constant 0 : i32
    %c0_i32_1 = arith.constant 0 : i32
    return %c0_i32, %c0_i32_0 : i32, i32
  }
  func.func @transform_2(%arg0: i32, %arg1: i32) -> (i32, i32) {
    %c0_i32 = arith.constant 0 : i32
    %c0_i32_0 = arith.constant 0 : i32
    %c0_i32_1 = arith.constant 0 : i32
    return %c0_i32, %c0_i32_0 : i32, i32
  }
  func.func @transform_3(%arg0: i32, %arg1: i32) -> (i32, i32) {
    %c0_i32 = arith.constant 0 : i32
    %c0_i32_0 = arith.constant 0 : i32
    return %c0_i32, %arg1 : i32, i32
  }
  func.func @transform_4(%arg0: i32, %arg1: i32) -> (i32, i32) {
    %c0_i32 = arith.constant 0 : i32
    %c0_i32_0 = arith.constant 0 : i32
    return %c0_i32, %arg1 : i32, i32
  }
  func.func @transform_5(%arg0: i32, %arg1: i32) -> (i32, i32) {
    %c0_i32 = arith.constant 0 : i32
    %c0_i32_0 = arith.constant 0 : i32
    return %c0_i32, %arg1 : i32, i32
  }
  func.func @transform_6(%arg0: i32, %arg1: i32) -> (i32, i32) {
    %c0_i32 = arith.constant 0 : i32
    return %arg0, %arg1 : i32, i32
  }
}

</mosaic_0001>

<bundles_post_ra>
// kernel: tpu_custom_call.1
= control target key start
LH: loop header
LB: loop body
LE: loop exit
PB: predicated region body
PF: predicated region fallthrough
CT: control target
= control target key end

     0   :  { %11 = vsyncpa [#allocation4], 0  ;;  %s4254_s0 = inlined_call_operand.hbm [shape: bf16[8,4,324], index: 0, kind: input, shape index: {}]   ;;  %s4255_s1 = inlined_call_operand.vmem [shape: bf16[8,36], index: 1, kind: input, shape index: {}]   ;;  %s4256_s2 = inlined_call_operand.vmem [shape: f32[8,1], index: 2, kind: input, shape index: {}]   ;;  %s4257_s3 = inlined_call_operand.hbm [shape: bf16[286,128], index: 3, kind: input, shape index: {}]   ;;  %s4258_s4 = inlined_call_operand.vmem [shape: f32[8,128], index: 4, kind: input, shape index: {}]   ;;  %s4259_s5 = inlined_call_operand.vmem [shape: f32[1,128], index: 5, kind: input, shape index: {}]   ;;  %s4260_s6 = inlined_call_operand.hbm [shape: f32[8,128], index: 6, kind: output, shape index: {}]  }
   0x1   :  { %12 = vsyncpa [#allocation7], 0 }
   0x2   :  { %13 = vsyncpa [#allocation5], 0  ;;  %s3054_s21 = smov [#allocation3]   ;;  %s2982_s25 = scalar_lea.hbm %s4254_s0, 768 }
   0x3   :  { %s19_s22 = sshll.u32 %s3054_s21, 4  ;;  %p2983_p0 = scmp.ne.s32.totalorder %s4254_s0, %s2982_s25  ;;  %s20_s22 = int_to_ptr.vmem [resolvable:$true] %s19_s22 }
   0x4   :  { %p2986_p1 = scmp.lt.u32.totalorder %s2982_s25, %s4254_s0 }
   0x6   :  { %p2988_p2 = pnand %p2986_p1, %p2983_p0 }
   0x8   :  { %2991 = shalt.err (!%p2988_p2)
}
   0x9   :  { %s2992_s30 = scalar_lea.vmem %s20_s22, 768  ;;  %p2997_p4 = scmp.lt.s32.totalorder %s20_s22, %s20_s22 }
   0xa   :  { %p2993_p3 = scmp.ne.s32.totalorder %s20_s22, %s2992_s30  ;;  %p2998_p5 = scmp.lt.s32.totalorder %s2992_s30, %s2992_s30 }
   0xc   :  { %p2999_p6 = por %p2998_p5, %p2997_p4 }
   0xe   :  { %p3000_p7 = pnand %p2999_p6, %p2993_p3 }
  0x10   :  { %3003 = shalt.err (!%p3000_p7)
}
  0x11   :  { %s3055_s7 = smov 96   ;;  %s3056_s8 = smov 6  }
  0x12   :  { %25 = dma.hbm_to_vmem [thread:$0]  %s4254_s0, 768, %s20_s22, [#allocation4], %s3055_s7, %s3055_s7, %s3056_s8  }
  0x13   :  { %s3057_s11 = smov [#allocation6]   ;;  %s3004_s15 = scalar_lea.hbm %s4257_s3, 2304 }
  0x14   :  { %s35_s12 = sshll.u32 %s3057_s11, 4  ;;  %p3005_p8 = scmp.ne.s32.totalorder %s4257_s3, %s3004_s15  ;;  %s36_s12 = int_to_ptr.vmem [resolvable:$true] %s35_s12 }
  0x15   :  { %p3008_p9 = scmp.lt.u32.totalorder %s3004_s15, %s4257_s3 }
  0x17   :  { %p3010_p10 = pnand %p3008_p9, %p3005_p8 }
  0x19   :  { %3013 = shalt.err (!%p3010_p10)
}
  0x1a   :  { %s3014_s20 = scalar_lea.vmem %s36_s12, 2304  ;;  %p3019_p12 = scmp.lt.s32.totalorder %s36_s12, %s36_s12 }
  0x1b   :  { %p3015_p11 = scmp.ne.s32.totalorder %s36_s12, %s3014_s20  ;;  %p3020_p13 = scmp.lt.s32.totalorder %s3014_s20, %s3014_s20 }
  0x1d   :  { %p3021_p0 = por %p3020_p13, %p3019_p12 }
  0x1f   :  { %p3022_p1 = pnand %p3021_p0, %p3015_p11 }
  0x21   :  { %3025 = shalt.err (!%p3022_p1)
}
  0x22   :  { %s3058_s0 = smov 64   ;;  %s3059_s21 = smov 4  }
  0x23   :  { %41 = dma.hbm_to_vmem [thread:$0]  %s4257_s3, 2304, %s36_s12, [#allocation7], %s3058_s0, %s3058_s0, %s3059_s21  }
  0x24   :  { %3048 = dma.done.wait [#allocation4], 768  }
  0x25   :  { %3049 = vsyncadd [#allocation4], 4294966528 }
  0x26   :  { %3050 = dma.done.wait [#allocation7], 2304  }
  0x27   :  { %3051 = vsyncadd [#allocation7], 4294964992  ;;  %v77_v0 = vlaneseq  ;;  %v3060_v1 = vmov 1983009808   ;;  %v57_v6 = vld [vmem:[#allocation3] sm:$0x3f] }
  0x28   :  { %v75_v2 = vunpack.c.l.s4 %v3060_v1  ;;  %v201_v8 = vcombine.low %v57_v6, %v57_v6  ;;  %s3061_s24 = smov 126   ;;  %s3062_s3 = smov 127   ;;  %v73_v10 = vcombine.high %v57_v6, %v57_v6  ;;  %v58_v17 = vld [vmem:[#allocation3 + $0x6] sm:$0x3f]  ;;  %v3068_v19 = vmov 0  }
  0x29   :  { %v78_v3 = vshrl.u32 %v77_v0, 7  ;;  %s3063_s25 = smov 110   ;;  %s3064_s26 = smov 109   ;;  %v210_v18 = vcombine.low %v58_v17, %v58_v17  ;;  %1256 = vmatprep.mubr.bf16.mxu1 %v3068_v19  ;;  %1479 = vmatprep.mubr.bf16.mxu0 %v3068_v19  ;;  %v89_v23 = vcombine.high %v58_v17, %v58_v17  ;;  %v59_v29 = vld [vmem:[#allocation3 + $0xc] sm:$0x3f]  ;;  %vm321_vm0 = vcmask 1039360  }
  0x2a   :  { %v76_v4 = vunpack.c.0.s8 %v75_v2  ;;  %s3065_s27 = smov 108   ;;  %s3066_s28 = smov 92   ;;  %2882 = vset.pattern.permute.xlu0 %v3068_v19  ;;  %v219_v30 = vcombine.low %v59_v29, %v59_v29  ;;  %v105_v34 = vcombine.high %v59_v29, %v59_v29  ;;  %vm475_vm1 = vcmask 900096   ;;  %v60_v57 = vld [vmem:[#allocation3 + $0x12] sm:$0x3f] }
  0x2b   :  { %s3067_s29 = smov 91   ;;  %s3069_s30 = smov 90   ;;  %vm402_vm2 = vcmask 1031168   ;;  %vm817_vm3 = vcmask 1041408   ;;  %vm939_vm4 = vcmask 1045504   ;;  %vm890_vm5 = vcmask 1043456  }
  0x2c   :  { %v3132_v5 = vsub.s32 %v76_v4, %v78_v3  ;;  %v228_v63 = vcombine.low %v60_v57, %v60_v57  ;;  %vm605_vm6 = vcmask 883712   ;;  %vm670_vm7 = vcmask 752640  }
  0x2d   :  { %vm540_vm8 = vcmask 891904   ;;  %vm735_vm9 = vcmask 744448   ;;  %vm800_vm10 = vcmask 736256   ;;  %vm1211_vm11 = vcmask 293888  }
  0x2e   :  { %v3135_v7 = vrot.slane %v57_v6, %v3132_v5  ;;  %v208_v9 = vrot.slane %v201_v8, %v3132_v5  ;;  %v3147_v13 = vrot.slane %v73_v10, %v3132_v5  ;;  %v217_v20 = vrot.slane %v210_v18, %v3132_v5 }
  0x2f   :  { %v3188_v21 = vrot.slane %v58_v17, %v3132_v5  ;;  %v3194_v24 = vrot.slane %v89_v23, %v3132_v5  ;;  %v226_v31 = vrot.slane %v219_v30, %v3132_v5  ;;  %v3237_v32 = vrot.slane %v59_v29, %v3132_v5 }
  0x30   :  { %356 = vrot.lane.b32.xlu1 %v3135_v7, %s3061_s24  ;;  %277 = vrot.lane.b32.xlu0 %v3135_v7, %s3062_s3  ;;  %v209_v11 = vcombine.high %v208_v9, %v208_v9  ;;  %v338_v12 = vcombine.low %v3135_v7, %v3135_v7  ;;  %v339_v14 = vcombine.low %v3147_v13, %v3147_v13  ;;  %vm3071_vm12 = vmmov 0  }
  0x31   :  { %v3157_v15 = vcombine.high %v3135_v7, %v3135_v7  ;;  %v419_v16 = vcombine.low %v208_v9, %v208_v9  ;;  %v218_v22 = vcombine.high %v217_v20, %v217_v20  ;;  %v340_v25 = vcombine.low %v3188_v21, %v3188_v21 }
  0x32   :  { %v341_v26 = vcombine.low %v3194_v24, %v3194_v24  ;;  %v3209_v27 = vcombine.high %v3188_v21, %v3188_v21  ;;  %v420_v28 = vcombine.low %v217_v20, %v217_v20  ;;  %v227_v33 = vcombine.high %v226_v31, %v226_v31 }
  0x33   :  { %v3243_v35 = vrot.slane %v105_v34, %v3132_v5  ;;  %v342_v36 = vcombine.low %v3237_v32, %v3237_v32  ;;  %v3258_v38 = vcombine.high %v3237_v32, %v3237_v32  ;;  %v421_v39 = vcombine.low %v226_v31, %v226_v31 }
  0x34   :  { %273 = vrot.lane.b32.xlu1 %v208_v9, %s3062_s3  ;;  %429 = vrot.lane.b32.xlu0 %v208_v9, %s3063_s25  ;;  %v3306_v2 = vrot.slane %v228_v63, %v3132_v5  ;;  %v3315_v6 = vrot.slane %v60_v57, %v3132_v5  ;;  %v121_v8 = vcombine.high %v60_v57, %v60_v57  ;;  %v3070_v57 = vmov 0.0  }
  0x35   :  { %v343_v37 = vcombine.low %v3243_v35, %v3243_v35  ;;  %vm2296_vm13 = vcmask 1046528   ;;  %vm1325_vm15 = vcmask 244736  }
  0x36   :  { %v3334_v17 = vcombine.low %v3315_v6, %v3315_v6 }
  0x38   :  { %275 = vrot.lane.b32.xlu0 %v209_v11, %s3062_s3  ;;  %354 = vrot.lane.b32.xlu1 %v338_v12, %s3061_s24 }
  0x3c   :  { %431 = vrot.lane.b32.xlu1 %v338_v12, %s3063_s25  ;;  %358 = vrot.lane.b32.xlu0 %v339_v14, %s3061_s24 }
  0x40   :  { %494 = vrot.lane.b32.xlu1 %v3157_v15, %s3064_s26  ;;  %427 = vrot.lane.b32.xlu0 %v419_v16, %s3063_s25 }
  0x44   :  { %559 = vrot.lane.b32.xlu1 %v209_v11, %s3065_s27  ;;  %496 = vrot.lane.b32.xlu0 %v3147_v13, %s3064_s26  ;;  %v3323_v11 = vrot.slane %v121_v8, %v3132_v5 }
  0x46   :  { %v3338_v18 = vcombine.low %v3323_v11, %v3323_v11 }
  0x48   :  { %492 = vrot.lane.b32.xlu1 %v3135_v7, %s3064_s26  ;;  %561 = vrot.lane.b32.xlu0 %v3135_v7, %s3065_s27 }
  0x4c   :  { %624 = vrot.lane.b32.xlu1 %v3135_v7, %s3066_s28  ;;  %557 = vrot.lane.b32.xlu0 %v208_v9, %s3065_s27 }
  0x50   :  { %622 = vrot.lane.b32.xlu1 %v338_v12, %s3066_s28  ;;  %626 = vrot.lane.b32.xlu0 %v339_v14, %s3066_s28 }
  0x54   :  { %691 = vrot.lane.b32.xlu1 %v338_v12, %s3067_s29  ;;  %689 = vrot.lane.b32.xlu0 %v208_v9, %s3067_s29 }
  0x58   :  { %752 = vrot.lane.b32.xlu1 %v3135_v7, %s3069_s30  ;;  %687 = vrot.lane.b32.xlu0 %v419_v16, %s3067_s29 }
  0x5c   :  { %756 = vrot.lane.b32.xlu1 %v3147_v13, %s3069_s30  ;;  %754 = vrot.lane.b32.xlu0 %v3157_v15, %s3069_s30 }
  0x60   :  { %283 = vrot.lane.b32.xlu1 %v3188_v21, %s3062_s3  ;;  %281 = vrot.lane.b32.xlu0 %v218_v22, %s3062_s3 }
  0x64   :  { %362 = vrot.lane.b32.xlu1 %v3188_v21, %s3061_s24  ;;  %279 = vrot.lane.b32.xlu0 %v217_v20, %s3062_s3 }
  0x68   :  { %360 = vrot.lane.b32.xlu1 %v340_v25, %s3061_s24  ;;  %364 = vrot.lane.b32.xlu0 %v341_v26, %s3061_s24 }
  0x6c   :  { %437 = vrot.lane.b32.xlu1 %v340_v25, %s3063_s25  ;;  %435 = vrot.lane.b32.xlu0 %v217_v20, %s3063_s25 }
  0x70   :  { %500 = vrot.lane.b32.xlu1 %v3209_v27, %s3064_s26  ;;  %433 = vrot.lane.b32.xlu0 %v420_v28, %s3063_s25 }
  0x74   :  { %565 = vrot.lane.b32.xlu1 %v218_v22, %s3065_s27  ;;  %502 = vrot.lane.b32.xlu0 %v3194_v24, %s3064_s26 }
  0x78   :  { %498 = vrot.lane.b32.xlu1 %v3188_v21, %s3064_s26  ;;  %567 = vrot.lane.b32.xlu0 %v3188_v21, %s3065_s27 }
  0x7c   :  { %630 = vrot.lane.b32.xlu1 %v3188_v21, %s3066_s28  ;;  %563 = vrot.lane.b32.xlu0 %v217_v20, %s3065_s27 }
  0x80   :  { %628 = vrot.lane.b32.xlu1 %v340_v25, %s3066_s28  ;;  %632 = vrot.lane.b32.xlu0 %v341_v26, %s3066_s28 }
  0x84   :  { %697 = vrot.lane.b32.xlu1 %v340_v25, %s3067_s29  ;;  %695 = vrot.lane.b32.xlu0 %v217_v20, %s3067_s29 }
  0x88   :  { %758 = vrot.lane.b32.xlu1 %v3188_v21, %s3069_s30  ;;  %693 = vrot.lane.b32.xlu0 %v420_v28, %s3067_s29 }
  0x8c   :  { %762 = vrot.lane.b32.xlu1 %v3194_v24, %s3069_s30  ;;  %760 = vrot.lane.b32.xlu0 %v3209_v27, %s3069_s30 }
  0x90   :  { %289 = vrot.lane.b32.xlu1 %v3237_v32, %s3062_s3  ;;  %287 = vrot.lane.b32.xlu0 %v227_v33, %s3062_s3 }
  0x94   :  { %368 = vrot.lane.b32.xlu1 %v3237_v32, %s3061_s24  ;;  %285 = vrot.lane.b32.xlu0 %v226_v31, %s3062_s3 }
  0x98   :  { %366 = vrot.lane.b32.xlu1 %v342_v36, %s3061_s24  ;;  %370 = vrot.lane.b32.xlu0 %v343_v37, %s3061_s24 }
  0x9c   :  { %443 = vrot.lane.b32.xlu1 %v342_v36, %s3063_s25  ;;  %441 = vrot.lane.b32.xlu0 %v226_v31, %s3063_s25 }
  0xa0   :  { %506 = vrot.lane.b32.xlu1 %v3258_v38, %s3064_s26  ;;  %439 = vrot.lane.b32.xlu0 %v421_v39, %s3063_s25 }
  0xa2   :  { %v357_v40 = vpop.permute.xlu1 %356  ;;  %v3263_v41 = vpop.permute.xlu0 %277 }
  0xa4   :  { %571 = vrot.lane.b32.xlu1 %v227_v33, %s3065_s27  ;;  %508 = vrot.lane.b32.xlu0 %v3243_v35, %s3064_s26 }
  0xa6   :  { %v274_v42 = vpop.permute.xlu1 %273  ;;  %v430_v43 = vpop.permute.xlu0 %429 }
  0xa8   :  { %504 = vrot.lane.b32.xlu1 %v3237_v32, %s3064_s26  ;;  %573 = vrot.lane.b32.xlu0 %v3237_v32, %s3065_s27 }
  0xaa   :  { %v276_v44 = vpop.permute.xlu0 %275  ;;  %v355_v45 = vpop.permute.xlu1 %354 }
  0xab   :  { %v323_v46 = vsel %vm321_vm0, %v276_v44, %v3263_v41  ;;  %v322_v47 = vsel %vm321_vm0, %v274_v42, %v276_v44  ;;  %v403_v53 = vsel %vm402_vm2, %v355_v45, %v357_v40  ;;  %v3367_v44 = vcombine.low %v3306_v2, %v3306_v2 }
  0xac   :  { %636 = vrot.lane.b32.xlu1 %v3237_v32, %s3066_s28  ;;  %569 = vrot.lane.b32.xlu0 %v226_v31, %s3065_s27  ;;  %v823_v52 = vsel %vm817_vm3, %v3157_v15, %v323_v46  ;;  %v820_v55 = vsel %vm817_vm3, %v3135_v7, %v322_v47  ;;  %v236_v7 = vcombine.high %v3306_v2, %v3306_v2 }
  0xad   :  { %v892_v61 = vsel %vm890_vm5, %v820_v55, %v403_v53 }
  0xae   :  { %v3278_v48 = vpop.permute.xlu1 %431  ;;  %v3280_v49 = vpop.permute.xlu0 %358 }
  0xaf   :  { %v404_v50 = vsel %vm402_vm2, %v357_v40, %v3280_v49  ;;  %v477_v51 = vsel %vm475_vm1, %v430_v43, %v3278_v48 }
  0xb0   :  { %634 = vrot.lane.b32.xlu1 %v342_v36, %s3066_s28  ;;  %638 = vrot.lane.b32.xlu0 %v343_v37, %s3066_s28  ;;  %v894_v54 = vsel %vm890_vm5, %v823_v52, %v404_v50  ;;  %v826_v52 = vsel %vm817_vm3, %v3147_v13, %v3263_v41 }
  0xb1   :  { %v944_v56 = vsel %vm939_vm4, %v894_v54, %v477_v51  ;;  %v896_v53 = vsel %vm890_vm5, %v826_v52, %v3280_v49 }
  0xb2   :  { %v495_v58 = vpop.permute.xlu1 %494  ;;  %1224 = vmatprep.subr.bf16.mxu1 %v944_v56  ;;  %v428_v59 = vpop.permute.xlu0 %427  ;;  %v3387_v56 = vld [vmem:[%s4255_s1] sm:$0xf]  ;;  %v947_v13 = vsel %vm939_vm4, %v896_v53, %v3278_v48 }
  0xb3   :  { %v476_v60 = vsel %vm475_vm1, %v428_v59, %v430_v43  ;;  %v3363_v43 = vcombine.high %v3315_v6, %v3315_v6 }
  0xb4   :  { %703 = vrot.lane.b32.xlu1 %v342_v36, %s3067_s29  ;;  %701 = vrot.lane.b32.xlu0 %v226_v31, %s3067_s29  ;;  %v941_v62 = vsel %vm939_vm4, %v892_v61, %v476_v60 }
  0xb5   :  { %1225 = vmatpush1.bf16.msra.mxu1 %v941_v62 }
  0xb6   :  { %v560_v0 = vpop.permute.xlu1 %559  ;;  %v3300_v1 = vpop.permute.xlu0 %496 }
  0xb7   :  { %v542_v20 = vsel %vm540_vm8, %v495_v58, %v3300_v1 }
  0xb8   :  { %764 = vrot.lane.b32.xlu1 %v3237_v32, %s3069_s30  ;;  %699 = vrot.lane.b32.xlu0 %v421_v39, %s3067_s29 }
  0xba   :  { %v493_v3 = vpop.permute.xlu1 %492  ;;  %v3308_v4 = vpop.permute.xlu0 %561 }
  0xbb   :  { %v607_v15 = vsel %vm605_vm6, %v560_v0, %v3308_v4  ;;  %v541_v33 = vsel %vm540_vm8, %v493_v3, %v495_v58  ;;  %v1020_v58 = vsel %vm817_vm3, %v3300_v1, %v3308_v4 }
  0xbc   :  { %768 = vrot.lane.b32.xlu1 %v3243_v35, %s3069_s30  ;;  %766 = vrot.lane.b32.xlu0 %v3258_v38, %s3069_s30  ;;  %v1017_v22 = vsel %vm817_vm3, %v542_v20, %v607_v15 }
  0xbe   :  { %v625_v9 = vpop.permute.xlu1 %624  ;;  %v558_v10 = vpop.permute.xlu0 %557 }
  0xbf   :  { %v606_v26 = vsel %vm605_vm6, %v558_v10, %v560_v0 }
  0xc0   :  { %295 = vrot.lane.b32.xlu1 %v3315_v6, %s3062_s3  ;;  %293 = vrot.lane.b32.xlu0 %v236_v7, %s3062_s3  ;;  %v1014_v34 = vsel %vm817_vm3, %v541_v33, %v606_v26 }
  0xc2   :  { %v623_v12 = vpop.permute.xlu1 %622  ;;  %v627_v14 = vpop.permute.xlu0 %626 }
  0xc3   :  { %v672_v16 = vsel %vm670_vm7, %v625_v9, %v627_v14  ;;  %v671_v30 = vsel %vm670_vm7, %v623_v12, %v625_v9  ;;  %v1089_v59 = vsel %vm890_vm5, %v1020_v58, %v627_v14  ;;  %v61_v12 = vld [vmem:[#allocation3 + $0x18] sm:$0x3f] }
  0xc4   :  { %374 = vrot.lane.b32.xlu1 %v3315_v6, %s3061_s24  ;;  %291 = vrot.lane.b32.xlu0 %v3306_v2, %s3062_s3  ;;  %v1087_v29 = vsel %vm890_vm5, %v1017_v22, %v672_v16  ;;  %v1085_v40 = vsel %vm890_vm5, %v1014_v34, %v671_v30  ;;  %v137_v30 = vcombine.high %v61_v12, %v61_v12 }
  0xc6   :  { %v692_v23 = vpop.permute.xlu1 %691  ;;  %v690_v25 = vpop.permute.xlu0 %689  ;;  %v3471_v34 = vrot.slane %v137_v30, %v3132_v5 }
  0xc7   :  { %v737_v28 = vsel %vm735_vm9, %v690_v25, %v692_v23  ;;  %v1139_v48 = vsel %vm939_vm4, %v1089_v59, %v692_v23  ;;  %v237_v23 = vcombine.low %v61_v12, %v61_v12 }
  0xc8   :  { %372 = vrot.lane.b32.xlu1 %v3334_v17, %s3061_s24  ;;  %376 = vrot.lane.b32.xlu0 %v3338_v18, %s3061_s24  ;;  %v1136_v31 = vsel %vm939_vm4, %v1087_v29, %v737_v28 }
  0xc9   :  { %1226 = vmatprep.subr.bf16.mxu1 %v1136_v31  ;;  %v3454_v26 = vrot.slane %v237_v23, %v3132_v5 }
  0xca   :  { %v753_v36 = vpop.permute.xlu1 %752  ;;  %v688_v37 = vpop.permute.xlu0 %687 }
  0xcb   :  { %v736_v39 = vsel %vm735_vm9, %v688_v37, %v690_v25  ;;  %v245_v29 = vcombine.high %v3454_v26, %v3454_v26 }
  0xcc   :  { %449 = vrot.lane.b32.xlu1 %v3334_v17, %s3063_s25  ;;  %447 = vrot.lane.b32.xlu0 %v3306_v2, %s3063_s25  ;;  %v1133_v42 = vsel %vm939_vm4, %v1085_v40, %v736_v39 }
  0xcd   :  { %1227 = vmatpush1.bf16.msra.mxu1 %v1133_v42 }
  0xce   :  { %v757_v45 = vpop.permute.xlu1 %756  ;;  %v755_v46 = vpop.permute.xlu0 %754 }
  0xcf   :  { %v802_v47 = vsel %vm800_vm10, %v755_v46, %v757_v45  ;;  %v801_v50 = vsel %vm800_vm10, %v753_v36, %v755_v46  ;;  %v1222_v0 = vsel %vm817_vm3, %v757_v45, 0 }
  0xd0   :  { %512 = vrot.lane.b32.xlu1 %v3363_v43, %s3064_s26  ;;  %445 = vrot.lane.b32.xlu0 %v3367_v44, %s3063_s25  ;;  %v1216_v51 = vsel %vm817_vm3, %v801_v50, 0 }
  0xd1   :  { %2613 = vmatprep.subr.msk.bf16.mxu1 %vm817_vm3, %v802_v47 }
  0xd2   :  { %1229 = vmatpush1.bf16.msra.mxu1 %v1216_v51  ;;  %v3382_v54 = vpop.permute.xlu1 %283  ;;  %v282_v55 = vpop.permute.xlu0 %281 }
  0xd3   :  { %2770 = vmatprep.subr.bf16.mxu1 %v3070_v57  ;;  %v325_v62 = vsel %vm321_vm0, %v282_v55, %v3382_v54 }
  0xd4   :  { %577 = vrot.lane.b32.xlu1 %v236_v7, %s3065_s27  ;;  %514 = vrot.lane.b32.xlu0 %v3323_v11, %s3064_s26  ;;  %v832_v1 = vsel %vm817_vm3, %v3209_v27, %v325_v62 }
  0xd5   :  { %2614 = vmatmul.mubr.msk.bf16.vlgmr.msra.gmra.mrb[0].mxu1 %vm1211_vm11, %v3387_v56 }
  0xd6   :  { %2771 = vmatpush3.bf16.msra.mxu1 %v947_v13  ;;  %v363_v41 = vpop.permute.xlu1 %362  ;;  %v280_v49 = vpop.permute.xlu0 %279  ;;  %2776 = vmatprep.mubr.msk.bf16.mxu1 %vm3071_vm12, %v3070_v57 }
  0xd7   :  { %2772 = vmatprep.subr.bf16.mxu1 %v3070_v57  ;;  %v324_v7 = vsel %vm321_vm0, %v280_v49, %v282_v55 }
  0xd8   :  { %510 = vrot.lane.b32.xlu1 %v3315_v6, %s3064_s26  ;;  %579 = vrot.lane.b32.xlu0 %v3315_v6, %s3065_s27  ;;  %v829_v14 = vsel %vm817_vm3, %v3188_v21, %v324_v7 }
  0xda   :  { %2773 = vmatpush3.bf16.msra.mxu1 %v1139_v48  ;;  %v361_v60 = vpop.permute.xlu1 %360  ;;  %v3409_v61 = vpop.permute.xlu0 %364 }
  0xdb   :  { %2774 = vmatprep.subr.bf16.mxu1 %v3070_v57  ;;  %v406_v63 = vsel %vm402_vm2, %v363_v41, %v3409_v61  ;;  %v405_v10 = vsel %vm402_vm2, %v361_v60, %v363_v41 }
  0xdc   :  { %642 = vrot.lane.b32.xlu1 %v3315_v6, %s3066_s28  ;;  %575 = vrot.lane.b32.xlu0 %v3306_v2, %s3065_s27  ;;  %v900_v9 = vsel %vm890_vm5, %v832_v1, %v406_v63  ;;  %v898_v20 = vsel %vm890_vm5, %v829_v14, %v405_v10 }
  0xde   :  { %2775 = vmatpush3.bf16.msra.mxu1 %v1222_v0  ;;  %v3423_v3 = vpop.permute.xlu1 %437  ;;  %v436_v4 = vpop.permute.xlu0 %435  ;;  %v3515_v0 = vcombine.low %v3454_v26, %v3454_v26 }
  0xdf   :  { %v479_v8 = vsel %vm475_vm1, %v436_v4, %v3423_v3 }
  0xe0   :  { %640 = vrot.lane.b32.xlu1 %v3334_v17, %s3066_s28  ;;  %644 = vrot.lane.b32.xlu0 %v3338_v18, %s3066_s28  ;;  %v953_v27 = vsel %vm939_vm4, %v900_v9, %v479_v8 }
  0xe1   :  { %1336 = vmatprep.subr.bf16.mxu1 %v953_v27  ;;  %2777 = vmatmul.mubr.msk.bf16.vlgmr.msra.gmra.mrb[4].mxu1 %vm1211_vm11, %v3387_v56 }
  0xe2   :  { %v501_v15 = vpop.permute.xlu1 %500  ;;  %v434_v16 = vpop.permute.xlu0 %433  ;;  %1368 = vmatprep.mubr.bf16.mxu1 %v3068_v19 }
  0xe3   :  { %v478_v22 = vsel %vm475_vm1, %v434_v16, %v436_v4 }
  0xe4   :  { %709 = vrot.lane.b32.xlu1 %v3334_v17, %s3067_s29  ;;  %707 = vrot.lane.b32.xlu0 %v3306_v2, %s3067_s29  ;;  %v950_v18 = vsel %vm939_vm4, %v898_v20, %v478_v22  ;;  %v3463_v2 = vrot.slane %v61_v12, %v3132_v5  ;;  %v835_v12 = vsel %vm817_vm3, %v3194_v24, %v3382_v54 }
  0xe5   :  { %1337 = vmatpush1.bf16.msra.mxu1 %v950_v18  ;;  %v902_v14 = vsel %vm890_vm5, %v835_v12, %v3409_v61 }
  0xe6   :  { %v566_v25 = vpop.permute.xlu1 %565  ;;  %v3447_v21 = vpop.permute.xlu0 %502  ;;  %v3482_v42 = vcombine.low %v3463_v2, %v3463_v2  ;;  %v3511_v63 = vcombine.high %v3463_v2, %v3463_v2 }
  0xe7   :  { %v544_v45 = vsel %vm540_vm8, %v501_v15, %v3447_v21 }
  0xe8   :  { %770 = vrot.lane.b32.xlu1 %v3315_v6, %s3069_s30  ;;  %705 = vrot.lane.b32.xlu0 %v3367_v44, %s3067_s29  ;;  %v3486_v44 = vcombine.low %v3471_v34, %v3471_v34 }
  0xea   :  { %v499_v17 = vpop.permute.xlu1 %498  ;;  %v3456_v28 = vpop.permute.xlu0 %567 }
  0xeb   :  { %v609_v39 = vsel %vm605_vm6, %v566_v25, %v3456_v28  ;;  %v543_v41 = vsel %vm540_vm8, %v499_v17, %v501_v15  ;;  %v956_v15 = vsel %vm939_vm4, %v902_v14, %v3423_v3  ;;  %v1029_v24 = vsel %vm817_vm3, %v3447_v21, %v3456_v28 }
  0xec   :  { %774 = vrot.lane.b32.xlu1 %v3323_v11, %s3069_s30  ;;  %772 = vrot.lane.b32.xlu0 %v3363_v43, %s3069_s30  ;;  %v1026_v46 = vsel %vm817_vm3, %v544_v45, %v609_v39  ;;  %v62_v39 = vld [vmem:[#allocation3 + $0x1e] sm:$0x3f] }
  0xee   :  { %v631_v31 = vpop.permute.xlu1 %630  ;;  %v564_v33 = vpop.permute.xlu0 %563 }
  0xef   :  { %v608_v51 = vsel %vm605_vm6, %v564_v33, %v566_v25 }
  0xf0   :  { %301 = vrot.lane.b32.xlu1 %v3463_v2, %s3062_s3  ;;  %299 = vrot.lane.b32.xlu0 %v245_v29, %s3062_s3  ;;  %v1023_v49 = vsel %vm817_vm3, %v543_v41, %v608_v51  ;;  %v153_v41 = vcombine.high %v62_v39, %v62_v39 }
  0xf2   :  { %v629_v36 = vpop.permute.xlu1 %628  ;;  %v633_v37 = vpop.permute.xlu0 %632 }
  0xf3   :  { %v674_v40 = vsel %vm670_vm7, %v631_v31, %v633_v37  ;;  %v673_v55 = vsel %vm670_vm7, %v629_v36, %v631_v31  ;;  %v1095_v54 = vsel %vm890_vm5, %v1029_v24, %v633_v37 }
  0xf4   :  { %380 = vrot.lane.b32.xlu1 %v3463_v2, %s3061_s24  ;;  %297 = vrot.lane.b32.xlu0 %v3454_v26, %s3062_s3  ;;  %v1093_v53 = vsel %vm890_vm5, %v1026_v46, %v674_v40  ;;  %v1091_v48 = vsel %vm890_vm5, %v1023_v49, %v673_v55 }
  0xf6   :  { %v698_v47 = vpop.permute.xlu1 %697  ;;  %v696_v50 = vpop.permute.xlu0 %695 }
  0xf7   :  { %v739_v52 = vsel %vm735_vm9, %v696_v50, %v698_v47  ;;  %v1148_v61 = vsel %vm939_vm4, %v1095_v54, %v698_v47 }
  0xf8   :  { %378 = vrot.lane.b32.xlu1 %v3482_v42, %s3061_s24  ;;  %382 = vrot.lane.b32.xlu0 %v3486_v44, %s3061_s24  ;;  %v1145_v13 = vsel %vm939_vm4, %v1093_v53, %v739_v52 }
  0xf9   :  { %1338 = vmatprep.subr.bf16.mxu1 %v1145_v13 }
  0xfa   :  { %v759_v58 = vpop.permute.xlu1 %758  ;;  %v694_v59 = vpop.permute.xlu0 %693 }
  0xfb   :  { %v738_v60 = vsel %vm735_vm9, %v694_v59, %v696_v50  ;;  %v246_v50 = vcombine.low %v62_v39, %v62_v39  ;;  %v3608_v59 = vrot.slane %v153_v41, %v3132_v5 }
  0xfc   :  { %455 = vrot.lane.b32.xlu1 %v3482_v42, %s3063_s25  ;;  %453 = vrot.lane.b32.xlu0 %v3454_v26, %s3063_s25  ;;  %v1142_v62 = vsel %vm939_vm4, %v1091_v48, %v738_v60 }
  0xfd   :  { %1339 = vmatpush1.bf16.msra.mxu1 %v1142_v62  ;;  %v3593_v53 = vrot.slane %v246_v50, %v3132_v5 }
  0xfe   :  { %v763_v1 = vpop.permute.xlu1 %762  ;;  %v761_v4 = vpop.permute.xlu0 %760 }
  0xff   :  { %v803_v7 = vsel %vm800_vm10, %v759_v58, %v761_v4  ;;  %v804_v8 = vsel %vm800_vm10, %v761_v4, %v763_v1  ;;  %v1334_v21 = vsel %vm817_vm3, %v763_v1, 0  ;;  %v254_v13 = vcombine.high %v3593_v53, %v3593_v53 }
 0x100   :  { %518 = vrot.lane.b32.xlu1 %v3511_v63, %s3064_s26  ;;  %451 = vrot.lane.b32.xlu0 %v3515_v0, %s3063_s25  ;;  %v1328_v9 = vsel %vm817_vm3, %v803_v7, 0  ;;  %v3622_v4 = vcombine.low %v3608_v59, %v3608_v59 }
 0x101   :  { %2619 = vmatprep.subr.msk.bf16.mxu1 %vm817_vm3, %v804_v8 }
 0x102   :  { %1341 = vmatpush1.bf16.msra.mxu1 %v1328_v9  ;;  %v290_v10 = vpop.permute.xlu1 %289  ;;  %v288_v27 = vpop.permute.xlu0 %287 }
 0x103   :  { %2780 = vmatprep.subr.bf16.mxu1 %v3070_v57  ;;  %v327_v18 = vsel %vm321_vm0, %v288_v27, %v290_v10  ;;  %v844_v25 = vsel %vm817_vm3, %v3243_v35, %v290_v10 }
 0x104   :  { %583 = vrot.lane.b32.xlu1 %v245_v29, %s3065_s27  ;;  %520 = vrot.lane.b32.xlu0 %v3471_v34, %s3064_s26  ;;  %v841_v30 = vsel %vm817_vm3, %v3258_v38, %v327_v18 }
 0x105   :  { %2620 = vmatmul.mubr.msk.bf16.vlgmr.msra.gmra.mrb[8].mxu1 %vm1211_vm11, %v3387_v56 }
 0x106   :  { %2781 = vmatpush3.bf16.msra.mxu1 %v956_v15  ;;  %v369_v16 = vpop.permute.xlu1 %368  ;;  %v286_v20 = vpop.permute.xlu0 %285  ;;  %2786 = vmatprep.mubr.msk.bf16.mxu1 %vm3071_vm12, %v3070_v57 }
 0x107   :  { %2782 = vmatprep.subr.bf16.mxu1 %v3070_v57  ;;  %v326_v31 = vsel %vm321_vm0, %v286_v20, %v288_v27 }
 0x108   :  { %516 = vrot.lane.b32.xlu1 %v3463_v2, %s3064_s26  ;;  %585 = vrot.lane.b32.xlu0 %v3463_v2, %s3065_s27  ;;  %v838_v40 = vsel %vm817_vm3, %v3237_v32, %v326_v31 }
 0x10a   :  { %2783 = vmatpush3.bf16.msra.mxu1 %v1148_v61  ;;  %v367_v3 = vpop.permute.xlu1 %366  ;;  %v371_v22 = vpop.permute.xlu0 %370 }
 0x10b   :  { %2784 = vmatprep.subr.bf16.mxu1 %v3070_v57  ;;  %v408_v23 = vsel %vm402_vm2, %v369_v16, %v371_v22  ;;  %v908_v17 = vsel %vm890_vm5, %v844_v25, %v371_v22  ;;  %v407_v37 = vsel %vm402_vm2, %v367_v3, %v369_v16 }
 0x10c   :  { %648 = vrot.lane.b32.xlu1 %v3463_v2, %s3066_s28  ;;  %581 = vrot.lane.b32.xlu0 %v3454_v26, %s3065_s27  ;;  %v906_v36 = vsel %vm890_vm5, %v841_v30, %v408_v23 }
 0x10e   :  { %2785 = vmatpush3.bf16.msra.mxu1 %v1334_v21  ;;  %v444_v28 = vpop.permute.xlu1 %443  ;;  %v442_v29 = vpop.permute.xlu0 %441 }
 0x10f   :  { %2790 = vmatprep.subr.bf16.mxu1 %v3070_v57  ;;  %v481_v33 = vsel %vm475_vm1, %v442_v29, %v444_v28  ;;  %v965_v35 = vsel %vm939_vm4, %v908_v17, %v444_v28  ;;  %v424_v28 = vcombine.low %v3593_v53, %v3593_v53 }
 0x110   :  { %646 = vrot.lane.b32.xlu1 %v3482_v42, %s3066_s28  ;;  %650 = vrot.lane.b32.xlu0 %v3486_v44, %s3066_s28  ;;  %v962_v38 = vsel %vm939_vm4, %v906_v36, %v481_v33  ;;  %v904_v44 = vsel %vm890_vm5, %v838_v40, %v407_v37 }
 0x111   :  { %2787 = vmatmul.mubr.msk.bf16.vlgmr.msra.gmra.mrb[12].mxu1 %vm1211_vm11, %v3387_v56  ;;  %1447 = vmatprep.subr.bf16.mxu0 %v962_v38 }
 0x112   :  { %2791 = vmatpush3.bf16.msra.mxu1 %v965_v35  ;;  %v507_v45 = vpop.permute.xlu1 %506  ;;  %v440_v46 = vpop.permute.xlu0 %439  ;;  %2796 = vmatprep.mubr.msk.bf16.mxu1 %vm3071_vm12, %v3070_v57 }
 0x113   :  { %v480_v47 = vsel %vm475_vm1, %v440_v46, %v442_v29  ;;  %2792 = vmatprep.subr.bf16.mxu1 %v3070_v57 }
 0x114   :  { %715 = vrot.lane.b32.xlu1 %v3482_v42, %s3067_s29  ;;  %713 = vrot.lane.b32.xlu0 %v3454_v26, %s3067_s29  ;;  %v959_v32 = vsel %vm939_vm4, %v904_v44, %v480_v47  ;;  %v3600_v26 = vrot.slane %v62_v39, %v3132_v5 }
 0x115   :  { %1448 = vmatpush1.bf16.msra.mxu0 %v959_v32 }
 0x116   :  { %v572_v51 = vpop.permute.xlu1 %571  ;;  %v509_v52 = vpop.permute.xlu0 %508  ;;  %v3618_v1 = vcombine.low %v3600_v26, %v3600_v26  ;;  %v3650_v17 = vcombine.high %v3600_v26, %v3600_v26 }
 0x117   :  { %v546_v7 = vsel %vm540_vm8, %v507_v45, %v509_v52 }
 0x118   :  { %776 = vrot.lane.b32.xlu1 %v3463_v2, %s3069_s30  ;;  %711 = vrot.lane.b32.xlu0 %v3515_v0, %s3067_s29 }
 0x11a   :  { %v505_v55 = vpop.permute.xlu1 %504  ;;  %v574_v42 = vpop.permute.xlu0 %573 }
 0x11b   :  { %v611_v62 = vsel %vm605_vm6, %v572_v51, %v574_v42  ;;  %v1038_v8 = vsel %vm817_vm3, %v509_v52, %v574_v42  ;;  %v545_v61 = vsel %vm540_vm8, %v505_v55, %v507_v45 }
 0x11c   :  { %780 = vrot.lane.b32.xlu1 %v3471_v34, %s3069_s30  ;;  %778 = vrot.lane.b32.xlu0 %v3511_v63, %s3069_s30  ;;  %v1035_v9 = vsel %vm817_vm3, %v546_v7, %v611_v62 }
 0x11e   :  { %v637_v49 = vpop.permute.xlu1 %636  ;;  %v570_v58 = vpop.permute.xlu0 %569 }
 0x11f   :  { %v610_v14 = vsel %vm605_vm6, %v570_v58, %v572_v51 }
 0x120   :  { %307 = vrot.lane.b32.xlu1 %v3600_v26, %s3062_s3  ;;  %305 = vrot.lane.b32.xlu0 %v254_v13, %s3062_s3  ;;  %v1032_v3 = vsel %vm817_vm3, %v545_v61, %v610_v14 }
 0x122   :  { %v635_v48 = vpop.permute.xlu1 %634  ;;  %v639_v60 = vpop.permute.xlu0 %638 }
 0x123   :  { %v676_v0 = vsel %vm670_vm7, %v637_v49, %v639_v60  ;;  %v1101_v10 = vsel %vm890_vm5, %v1038_v8, %v639_v60  ;;  %v675_v24 = vsel %vm670_vm7, %v635_v48, %v637_v49 }
 0x124   :  { %386 = vrot.lane.b32.xlu1 %v3600_v26, %s3061_s24  ;;  %303 = vrot.lane.b32.xlu0 %v3593_v53, %s3062_s3  ;;  %v1099_v20 = vsel %vm890_vm5, %v1035_v9, %v676_v0  ;;  %v1097_v25 = vsel %vm890_vm5, %v1032_v3, %v675_v24 }
 0x126   :  { %v704_v27 = vpop.permute.xlu1 %703  ;;  %v702_v12 = vpop.permute.xlu0 %701 }
 0x127   :  { %v741_v15 = vsel %vm735_vm9, %v702_v12, %v704_v27  ;;  %v1157_v16 = vsel %vm939_vm4, %v1101_v10, %v704_v27 }
 0x128   :  { %384 = vrot.lane.b32.xlu1 %v3618_v1, %s3061_s24  ;;  %388 = vrot.lane.b32.xlu0 %v3622_v4, %s3061_s24  ;;  %v1154_v54 = vsel %vm939_vm4, %v1099_v20, %v741_v15 }
 0x129   :  { %2793 = vmatpush3.bf16.msra.mxu1 %v1157_v16  ;;  %1449 = vmatprep.subr.bf16.mxu0 %v1154_v54 }
 0x12a   :  { %v765_v22 = vpop.permute.xlu1 %764  ;;  %v700_v18 = vpop.permute.xlu0 %699  ;;  %2794 = vmatprep.subr.bf16.mxu1 %v3070_v57 }
 0x12b   :  { %v740_v23 = vsel %vm735_vm9, %v700_v18, %v702_v12 }
 0x12c   :  { %461 = vrot.lane.b32.xlu1 %v3618_v1, %s3063_s25  ;;  %459 = vrot.lane.b32.xlu0 %v3593_v53, %s3063_s25  ;;  %v1151_v21 = vsel %vm939_vm4, %v1097_v25, %v740_v23 }
 0x12d   :  { %1450 = vmatpush1.bf16.msra.mxu0 %v1151_v21 }
 0x12e   :  { %v769_v29 = vpop.permute.xlu1 %768  ;;  %v767_v30 = vpop.permute.xlu0 %766 }
 0x12f   :  { %v806_v31 = vsel %vm800_vm10, %v767_v30, %v769_v29  ;;  %v1445_v33 = vsel %vm817_vm3, %v769_v29, 0  ;;  %v805_v36 = vsel %vm800_vm10, %v765_v22, %v767_v30 }
 0x130   :  { %524 = vrot.lane.b32.xlu1 %v3650_v17, %s3064_s26  ;;  %457 = vrot.lane.b32.xlu0 %v424_v28, %s3063_s25  ;;  %v1439_v35 = vsel %vm817_vm3, %v805_v36, 0 }
 0x131   :  { %2625 = vmatprep.subr.msk.bf16.mxu0 %vm817_vm3, %v806_v31  ;;  %2795 = vmatpush3.bf16.msra.mxu1 %v1445_v33 }
 0x132   :  { %1452 = vmatpush1.bf16.msra.mxu0 %v1439_v35  ;;  %v296_v37 = vpop.permute.xlu1 %295  ;;  %v294_v38 = vpop.permute.xlu0 %293  ;;  %2800 = vmatprep.subr.bf16.mxu1 %v3070_v57 }
 0x133   :  { %v329_v47 = vsel %vm321_vm0, %v294_v38, %v296_v37  ;;  %v853_v32 = vsel %vm817_vm3, %v3323_v11, %v296_v37 }
 0x134   :  { %589 = vrot.lane.b32.xlu1 %v254_v13, %s3065_s27  ;;  %526 = vrot.lane.b32.xlu0 %v3608_v59, %s3064_s26  ;;  %v850_v50 = vsel %vm817_vm3, %v3363_v43, %v329_v47  ;;  %v63_v43 = vld [vmem:[#allocation3 + $0x24] sm:$0x3f] }
 0x135   :  { %2797 = vmatmul.mubr.msk.bf16.vlgmr.msra.gmra.mrb[16].mxu1 %vm1211_vm11, %v3387_v56  ;;  %2626 = vmatmul.mubr.msk.bf16.vlgmr.msra.gmra.mrb[0].mxu0 %vm1211_vm11, %v3387_v56  ;;  %v255_v8 = vcombine.low %v63_v43, %v63_v43  ;;  %v169_v14 = vcombine.high %v63_v43, %v63_v43 }
 0x136   :  { %v375_v39 = vpop.permute.xlu1 %374  ;;  %v292_v40 = vpop.permute.xlu0 %291  ;;  %2806 = vmatprep.mubr.msk.bf16.mxu1 %vm3071_vm12, %v3070_v57  ;;  %1590 = vmatprep.mubr.bf16.mxu0 %v3068_v19 }
 0x137   :  { %v328_v42 = vsel %vm321_vm0, %v292_v40, %v294_v38  ;;  %v3712_v10 = vrot.slane %v255_v8, %v3132_v5  ;;  %v3727_v20 = vrot.slane %v169_v14, %v3132_v5 }
 0x138   :  { %522 = vrot.lane.b32.xlu1 %v3600_v26, %s3064_s26  ;;  %591 = vrot.lane.b32.xlu0 %v3600_v26, %s3065_s27  ;;  %v847_v48 = vsel %vm817_vm3, %v3315_v6, %v328_v42 }
 0x139   :  { %v3741_v18 = vcombine.low %v3727_v20, %v3727_v20 }
 0x13a   :  { %v373_v45 = vpop.permute.xlu1 %372  ;;  %v377_v46 = vpop.permute.xlu0 %376 }
 0x13b   :  { %v410_v44 = vsel %vm402_vm2, %v375_v39, %v377_v46  ;;  %v914_v51 = vsel %vm890_vm5, %v853_v32, %v377_v46  ;;  %v409_v58 = vsel %vm402_vm2, %v373_v45, %v375_v39 }
 0x13c   :  { %654 = vrot.lane.b32.xlu1 %v3600_v26, %s3066_s28  ;;  %587 = vrot.lane.b32.xlu0 %v3593_v53, %s3065_s27  ;;  %v912_v49 = vsel %vm890_vm5, %v850_v50, %v410_v44  ;;  %v910_v0 = vsel %vm890_vm5, %v847_v48, %v409_v58 }
 0x13e   :  { %v450_v52 = vpop.permute.xlu1 %449  ;;  %v448_v55 = vpop.permute.xlu0 %447 }
 0x13f   :  { %v483_v13 = vsel %vm475_vm1, %v448_v55, %v450_v52  ;;  %v974_v41 = vsel %vm939_vm4, %v914_v51, %v450_v52  ;;  %v425_v51 = vcombine.low %v3712_v10, %v3712_v10 }
 0x140   :  { %652 = vrot.lane.b32.xlu1 %v3618_v1, %s3066_s28  ;;  %656 = vrot.lane.b32.xlu0 %v3622_v4, %s3066_s28  ;;  %v971_v11 = vsel %vm939_vm4, %v912_v49, %v483_v13 }
 0x141   :  { %2801 = vmatpush3.bf16.msra.mxu1 %v974_v41  ;;  %1558 = vmatprep.subr.bf16.mxu0 %v971_v11 }
 0x142   :  { %v513_v60 = vpop.permute.xlu1 %512  ;;  %v446_v62 = vpop.permute.xlu0 %445  ;;  %2802 = vmatprep.subr.bf16.mxu1 %v3070_v57 }
 0x143   :  { %v482_v7 = vsel %vm475_vm1, %v446_v62, %v448_v55 }
 0x144   :  { %721 = vrot.lane.b32.xlu1 %v3618_v1, %s3067_s29  ;;  %719 = vrot.lane.b32.xlu0 %v3593_v53, %s3067_s29  ;;  %v968_v4 = vsel %vm939_vm4, %v910_v0, %v482_v7  ;;  %v3719_v53 = vrot.slane %v63_v43, %v3132_v5  ;;  %v263_v1 = vcombine.high %v3712_v10, %v3712_v10 }
 0x145   :  { %1559 = vmatpush1.bf16.msra.mxu0 %v968_v4 }
 0x146   :  { %v578_v9 = vpop.permute.xlu1 %577  ;;  %v515_v6 = vpop.permute.xlu0 %514  ;;  %v3737_v22 = vcombine.low %v3719_v53, %v3719_v53  ;;  %v3769_v50 = vcombine.high %v3719_v53, %v3719_v53 }
 0x147   :  { %v548_v23 = vsel %vm540_vm8, %v513_v60, %v515_v6 }
 0x148   :  { %782 = vrot.lane.b32.xlu1 %v3600_v26, %s3069_s30  ;;  %717 = vrot.lane.b32.xlu0 %v424_v28, %s3067_s29 }
 0x14a   :  { %v511_v27 = vpop.permute.xlu1 %510  ;;  %v580_v12 = vpop.permute.xlu0 %579 }
 0x14b   :  { %v613_v61 = vsel %vm605_vm6, %v578_v9, %v580_v12  ;;  %v1047_v25 = vsel %vm817_vm3, %v515_v6, %v580_v12  ;;  %v547_v39 = vsel %vm540_vm8, %v511_v27, %v513_v60 }
 0x14c   :  { %786 = vrot.lane.b32.xlu1 %v3608_v59, %s3069_s30  ;;  %784 = vrot.lane.b32.xlu0 %v3650_v17, %s3069_s30  ;;  %v1044_v21 = vsel %vm817_vm3, %v548_v23, %v613_v61 }
 0x14e   :  { %v643_v15 = vpop.permute.xlu1 %642  ;;  %v576_v16 = vpop.permute.xlu0 %575 }
 0x14f   :  { %v612_v31 = vsel %vm605_vm6, %v576_v16, %v578_v9 }
 0x150   :  { %313 = vrot.lane.b32.xlu1 %v3719_v53, %s3062_s3  ;;  %311 = vrot.lane.b32.xlu0 %v263_v1, %s3062_s3  ;;  %v1041_v40 = vsel %vm817_vm3, %v547_v39, %v612_v31 }
 0x152   :  { %v641_v24 = vpop.permute.xlu1 %640  ;;  %v645_v54 = vpop.permute.xlu0 %644 }
 0x153   :  { %v678_v3 = vsel %vm670_vm7, %v643_v15, %v645_v54  ;;  %v1107_v28 = vsel %vm890_vm5, %v1047_v25, %v645_v54  ;;  %v677_v37 = vsel %vm670_vm7, %v641_v24, %v643_v15 }
 0x154   :  { %392 = vrot.lane.b32.xlu1 %v3719_v53, %s3061_s24  ;;  %309 = vrot.lane.b32.xlu0 %v3712_v10, %s3062_s3  ;;  %v1105_v35 = vsel %vm890_vm5, %v1044_v21, %v678_v3  ;;  %v1103_v47 = vsel %vm890_vm5, %v1041_v40, %v677_v37 }
 0x156   :  { %v710_v29 = vpop.permute.xlu1 %709  ;;  %v708_v30 = vpop.permute.xlu0 %707 }
 0x157   :  { %v743_v33 = vsel %vm735_vm9, %v708_v30, %v710_v29  ;;  %v1166_v36 = vsel %vm939_vm4, %v1107_v28, %v710_v29 }
 0x158   :  { %390 = vrot.lane.b32.xlu1 %v3737_v22, %s3061_s24  ;;  %394 = vrot.lane.b32.xlu0 %v3741_v18, %s3061_s24  ;;  %v1163_v38 = vsel %vm939_vm4, %v1105_v35, %v743_v33 }
 0x159   :  { %2803 = vmatpush3.bf16.msra.mxu1 %v1166_v36  ;;  %1560 = vmatprep.subr.bf16.mxu0 %v1163_v38 }
 0x15a   :  { %v771_v45 = vpop.permute.xlu1 %770  ;;  %v706_v46 = vpop.permute.xlu0 %705  ;;  %2804 = vmatprep.subr.bf16.mxu1 %v3070_v57 }
 0x15b   :  { %v742_v44 = vsel %vm735_vm9, %v706_v46, %v708_v30 }
 0x15c   :  { %467 = vrot.lane.b32.xlu1 %v3737_v22, %s3063_s25  ;;  %465 = vrot.lane.b32.xlu0 %v3712_v10, %s3063_s25  ;;  %v1160_v32 = vsel %vm939_vm4, %v1103_v47, %v742_v44 }
 0x15d   :  { %1561 = vmatpush1.bf16.msra.mxu0 %v1160_v32 }
 0x15e   :  { %v775_v52 = vpop.permute.xlu1 %774  ;;  %v773_v55 = vpop.permute.xlu0 %772 }
 0x15f   :  { %v1556_v42 = vsel %vm817_vm3, %v775_v52, 0  ;;  %v807_v13 = vsel %vm800_vm10, %v771_v45, %v773_v55  ;;  %v808_v41 = vsel %vm800_vm10, %v773_v55, %v775_v52 }
 0x160   :  { %530 = vrot.lane.b32.xlu1 %v3769_v50, %s3064_s26  ;;  %463 = vrot.lane.b32.xlu0 %v425_v51, %s3063_s25  ;;  %v1550_v49 = vsel %vm817_vm3, %v807_v13, 0 }
 0x161   :  { %2631 = vmatprep.subr.msk.bf16.mxu0 %vm817_vm3, %v808_v41  ;;  %2805 = vmatpush3.bf16.msra.mxu1 %v1556_v42 }
 0x162   :  { %1563 = vmatpush1.bf16.msra.mxu0 %v1550_v49  ;;  %v302_v58 = vpop.permute.xlu1 %301  ;;  %v300_v11 = vpop.permute.xlu0 %299  ;;  %2810 = vmatprep.subr.bf16.mxu1 %v3070_v57 }
 0x163   :  { %v331_v0 = vsel %vm321_vm0, %v300_v11, %v302_v58  ;;  %v862_v4 = vsel %vm817_vm3, %v3471_v34, %v302_v58 }
 0x164   :  { %595 = vrot.lane.b32.xlu1 %v263_v1, %s3065_s27  ;;  %532 = vrot.lane.b32.xlu0 %v3727_v20, %s3064_s26  ;;  %v859_v8 = vsel %vm817_vm3, %v3511_v63, %v331_v0  ;;  %v64_v63 = vld [vmem:[#allocation3 + $0x2a] sm:$0x3f] }
 0x165   :  { %2807 = vmatmul.mubr.msk.bf16.vlgmr.msra.gmra.mrb[20].mxu1 %vm1211_vm11, %v3387_v56  ;;  %2632 = vmatmul.mubr.msk.bf16.vlgmr.msra.gmra.mrb[4].mxu0 %vm1211_vm11, %v3387_v56  ;;  %v264_v25 = vcombine.low %v64_v63, %v64_v63  ;;  %v185_v31 = vcombine.high %v64_v63, %v64_v63 }
 0x166   :  { %v381_v43 = vpop.permute.xlu1 %380  ;;  %v298_v48 = vpop.permute.xlu0 %297  ;;  %2816 = vmatprep.mubr.msk.bf16.mxu1 %vm3071_vm12, %v3070_v57  ;;  %1701 = vmatprep.mubr.bf16.mxu0 %v3068_v19 }
 0x167   :  { %v330_v12 = vsel %vm321_vm0, %v298_v48, %v300_v11  ;;  %v3831_v28 = vrot.slane %v264_v25, %v3132_v5  ;;  %v3846_v35 = vrot.slane %v185_v31, %v3132_v5 }
 0x168   :  { %528 = vrot.lane.b32.xlu1 %v3719_v53, %s3064_s26  ;;  %597 = vrot.lane.b32.xlu0 %v3719_v53, %s3065_s27  ;;  %v856_v24 = vsel %vm817_vm3, %v3463_v2, %v330_v12 }
 0x16a   :  { %v379_v60 = vpop.permute.xlu1 %378  ;;  %v383_v62 = vpop.permute.xlu0 %382 }
 0x16b   :  { %v412_v7 = vsel %vm402_vm2, %v381_v43, %v383_v62  ;;  %v920_v9 = vsel %vm890_vm5, %v862_v4, %v383_v62  ;;  %v411_v16 = vsel %vm402_vm2, %v379_v60, %v381_v43 }
 0x16c   :  { %660 = vrot.lane.b32.xlu1 %v3719_v53, %s3066_s28  ;;  %593 = vrot.lane.b32.xlu0 %v3712_v10, %s3065_s27  ;;  %v918_v15 = vsel %vm890_vm5, %v859_v8, %v412_v7  ;;  %v916_v3 = vsel %vm890_vm5, %v856_v24, %v411_v16  ;;  %v426_v8 = vcombine.low %v3831_v28, %v3831_v28 }
 0x16e   :  { %v456_v6 = vpop.permute.xlu1 %455  ;;  %v454_v27 = vpop.permute.xlu0 %453 }
 0x16f   :  { %v983_v1 = vsel %vm939_vm4, %v920_v9, %v456_v6  ;;  %v485_v14 = vsel %vm475_vm1, %v454_v27, %v456_v6 }
 0x170   :  { %658 = vrot.lane.b32.xlu1 %v3737_v22, %s3066_s28  ;;  %662 = vrot.lane.b32.xlu0 %v3741_v18, %s3066_s28  ;;  %v980_v34 = vsel %vm939_vm4, %v918_v15, %v485_v14 }
 0x171   :  { %2811 = vmatpush3.bf16.msra.mxu1 %v983_v1  ;;  %1669 = vmatprep.subr.bf16.mxu0 %v980_v34 }
 0x172   :  { %v519_v54 = vpop.permute.xlu1 %518  ;;  %v452_v61 = vpop.permute.xlu0 %451  ;;  %2812 = vmatprep.subr.bf16.mxu1 %v3070_v57 }
 0x173   :  { %v484_v23 = vsel %vm475_vm1, %v452_v61, %v454_v27 }
 0x174   :  { %727 = vrot.lane.b32.xlu1 %v3737_v22, %s3067_s29  ;;  %725 = vrot.lane.b32.xlu0 %v3712_v10, %s3067_s29  ;;  %v977_v18 = vsel %vm939_vm4, %v916_v3, %v484_v23  ;;  %v3838_v10 = vrot.slane %v64_v63, %v3132_v5  ;;  %v272_v22 = vcombine.high %v3831_v28, %v3831_v28 }
 0x175   :  { %1670 = vmatpush1.bf16.msra.mxu0 %v977_v18  ;;  %v3860_v5 = vcombine.low %v3846_v35, %v3846_v35 }
 0x176   :  { %v584_v21 = vpop.permute.xlu1 %583  ;;  %v521_v2 = vpop.permute.xlu0 %520  ;;  %v3856_v45 = vcombine.low %v3838_v10, %v3838_v10  ;;  %v3888_v4 = vcombine.high %v3838_v10, %v3838_v10 }
 0x177   :  { %v550_v46 = vsel %vm540_vm8, %v519_v54, %v521_v2 }
 0x178   :  { %788 = vrot.lane.b32.xlu1 %v3719_v53, %s3069_s30  ;;  %723 = vrot.lane.b32.xlu0 %v425_v51, %s3067_s29 }
 0x17a   :  { %v517_v29 = vpop.permute.xlu1 %516  ;;  %v586_v30 = vpop.permute.xlu0 %585 }
 0x17b   :  { %v615_v39 = vsel %vm605_vm6, %v584_v21, %v586_v30  ;;  %v1056_v47 = vsel %vm817_vm3, %v521_v2, %v586_v30  ;;  %v549_v11 = vsel %vm540_vm8, %v517_v29, %v519_v54 }
 0x17c   :  { %792 = vrot.lane.b32.xlu1 %v3727_v20, %s3069_s30  ;;  %790 = vrot.lane.b32.xlu0 %v3769_v50, %s3069_s30  ;;  %v1053_v44 = vsel %vm817_vm3, %v550_v46, %v615_v39 }
 0x17e   :  { %v649_v33 = vpop.permute.xlu1 %648  ;;  %v582_v36 = vpop.permute.xlu0 %581 }
 0x17f   :  { %v614_v55 = vsel %vm605_vm6, %v582_v36, %v584_v21 }
 0x180   :  { %319 = vrot.lane.b32.xlu1 %v3838_v10, %s3062_s3  ;;  %317 = vrot.lane.b32.xlu0 %v272_v22, %s3062_s3  ;;  %v1050_v43 = vsel %vm817_vm3, %v549_v11, %v614_v55 }
 0x182   :  { %v647_v37 = vpop.permute.xlu1 %646  ;;  %v651_v38 = vpop.permute.xlu0 %650 }
 0x183   :  { %v680_v40 = vsel %vm670_vm7, %v649_v33, %v651_v38  ;;  %v1113_v32 = vsel %vm890_vm5, %v1056_v47, %v651_v38  ;;  %v679_v49 = vsel %vm670_vm7, %v647_v37, %v649_v33 }
 0x184   :  { %398 = vrot.lane.b32.xlu1 %v3838_v10, %s3061_s24  ;;  %315 = vrot.lane.b32.xlu0 %v3831_v28, %s3062_s3  ;;  %v1111_v41 = vsel %vm890_vm5, %v1053_v44, %v680_v40  ;;  %v1109_v62 = vsel %vm890_vm5, %v1050_v43, %v679_v49 }
 0x186   :  { %v716_v51 = vpop.permute.xlu1 %715  ;;  %v714_v52 = vpop.permute.xlu0 %713 }
 0x187   :  { %v1175_v42 = vsel %vm939_vm4, %v1113_v32, %v716_v51  ;;  %v745_v13 = vsel %vm735_vm9, %v714_v52, %v716_v51  ;;  %v1205_v32 = vld [vmem:[%s4256_s2] sm:$0xff] }
 0x188   :  { %396 = vrot.lane.b32.xlu1 %v3856_v45, %s3061_s24  ;;  %400 = vrot.lane.b32.xlu0 %v3860_v5, %s3061_s24  ;;  %v1172_v58 = vsel %vm939_vm4, %v1111_v41, %v745_v13 }
 0x189   :  { %2813 = vmatpush3.bf16.msra.mxu1 %v1175_v42  ;;  %1671 = vmatprep.subr.bf16.mxu0 %v1172_v58 }
 0x18a   :  { %v777_v48 = vpop.permute.xlu1 %776  ;;  %v712_v60 = vpop.permute.xlu0 %711  ;;  %2814 = vmatprep.subr.bf16.mxu1 %v3070_v57 }
 0x18b   :  { %v744_v0 = vsel %vm735_vm9, %v712_v60, %v714_v52 }
 0x18c   :  { %473 = vrot.lane.b32.xlu1 %v3856_v45, %s3063_s25  ;;  %471 = vrot.lane.b32.xlu0 %v3831_v28, %s3063_s25  ;;  %v1169_v7 = vsel %vm939_vm4, %v1109_v62, %v744_v0 }
 0x18d   :  { %1672 = vmatpush1.bf16.msra.mxu0 %v1169_v7 }
 0x18e   :  { %v781_v9 = vpop.permute.xlu1 %780  ;;  %v779_v6 = vpop.permute.xlu0 %778 }
 0x18f   :  { %v1667_v27 = vsel %vm817_vm3, %v781_v9, 0  ;;  %v809_v12 = vsel %vm800_vm10, %v777_v48, %v779_v6  ;;  %v810_v1 = vsel %vm800_vm10, %v779_v6, %v781_v9 }
 0x190   :  { %v1661_v14 = vsel %vm817_vm3, %v809_v12, 0  ;;  %536 = vrot.lane.b32.xlu1 %v3888_v4, %s3064_s26  ;;  %469 = vrot.lane.b32.xlu0 %v426_v8, %s3063_s25 }
 0x191   :  { %2637 = vmatprep.subr.msk.bf16.mxu0 %vm817_vm3, %v810_v1  ;;  %2815 = vmatpush3.bf16.msra.mxu1 %v1667_v27 }
 0x192   :  { %1674 = vmatpush1.bf16.msra.mxu0 %v1661_v14  ;;  %v308_v15 = vpop.permute.xlu1 %307  ;;  %v306_v16 = vpop.permute.xlu0 %305  ;;  %2820 = vmatprep.subr.bf16.mxu1 %v3070_v57 }
 0x193   :  { %v333_v61 = vsel %vm321_vm0, %v306_v16, %v308_v15 }
 0x194   :  { %601 = vrot.lane.b32.xlu1 %v272_v22, %s3065_s27  ;;  %538 = vrot.lane.b32.xlu0 %v3846_v35, %s3064_s26  ;;  %v868_v23 = vsel %vm817_vm3, %v3650_v17, %v333_v61 }
 0x195   :  { %2817 = vmatmul.mubr.msk.bf16.vlgmr.msra.gmra.mrb[24].mxu1 %vm1211_vm11, %v3387_v56  ;;  %2638 = vmatmul.mubr.msk.bf16.vlgmr.msra.gmra.mrb[8].mxu0 %vm1211_vm11, %v3387_v56  ;;  %v871_v56 = vsel %vm817_vm3, %v3608_v59, %v308_v15 }
 0x196   :  { %v387_v34 = vpop.permute.xlu1 %386  ;;  %v304_v63 = vpop.permute.xlu0 %303  ;;  %2826 = vmatprep.mubr.msk.bf16.mxu1 %vm3071_vm12, %v3070_v57  ;;  %1812 = vmatprep.mubr.bf16.mxu0 %v3068_v19 }
 0x197   :  { %v332_v2 = vsel %vm321_vm0, %v304_v63, %v306_v16 }
 0x198   :  { %534 = vrot.lane.b32.xlu1 %v3838_v10, %s3064_s26  ;;  %603 = vrot.lane.b32.xlu0 %v3838_v10, %s3065_s27  ;;  %v865_v17 = vsel %vm817_vm3, %v3600_v26, %v332_v2 }
 0x19a   :  { %v385_v24 = vpop.permute.xlu1 %384  ;;  %v389_v54 = vpop.permute.xlu0 %388 }
 0x19b   :  { %v414_v3 = vsel %vm402_vm2, %v387_v34, %v389_v54  ;;  %v926_v18 = vsel %vm890_vm5, %v871_v56, %v389_v54  ;;  %v413_v31 = vsel %vm402_vm2, %v385_v24, %v387_v34 }
 0x19c   :  { %666 = vrot.lane.b32.xlu1 %v3838_v10, %s3066_s28  ;;  %599 = vrot.lane.b32.xlu0 %v3831_v28, %s3065_s27  ;;  %v924_v22 = vsel %vm890_vm5, %v868_v23, %v414_v3  ;;  %v922_v37 = vsel %vm890_vm5, %v865_v17, %v413_v31 }
 0x19e   :  { %v462_v25 = vpop.permute.xlu1 %461  ;;  %v460_v21 = vpop.permute.xlu0 %459 }
 0x19f   :  { %v992_v29 = vsel %vm939_vm4, %v926_v18, %v462_v25  ;;  %v487_v30 = vsel %vm475_vm1, %v460_v21, %v462_v25 }
 0x1a0   :  { %664 = vrot.lane.b32.xlu1 %v3856_v45, %s3066_s28  ;;  %668 = vrot.lane.b32.xlu0 %v3860_v5, %s3066_s28  ;;  %v989_v59 = vsel %vm939_vm4, %v924_v22, %v487_v30  ;;  %v3989_v30 = vld [vmem:[%s4255_s1] sm:$0xf] }
 0x1a1   :  { %2821 = vmatpush3.bf16.msra.mxu1 %v992_v29  ;;  %1780 = vmatprep.subr.bf16.mxu0 %v989_v59 }
 0x1a2   :  { %v525_v33 = vpop.permute.xlu1 %524  ;;  %v458_v36 = vpop.permute.xlu0 %457  ;;  %2822 = vmatprep.subr.bf16.mxu1 %v3070_v57 }
 0x1a3   :  { %v486_v38 = vsel %vm475_vm1, %v458_v36, %v460_v21 }
 0x1a4   :  { %733 = vrot.lane.b32.xlu1 %v3856_v45, %s3067_s29  ;;  %731 = vrot.lane.b32.xlu0 %v3831_v28, %s3067_s29  ;;  %v986_v39 = vsel %vm939_vm4, %v922_v37, %v486_v38 }
 0x1a5   :  { %1781 = vmatpush1.bf16.msra.mxu0 %v986_v39 }
 0x1a6   :  { %v590_v40 = vpop.permute.xlu1 %589  ;;  %v527_v5 = vpop.permute.xlu0 %526 }
 0x1a7   :  { %v552_v58 = vsel %vm540_vm8, %v525_v33, %v527_v5 }
 0x1a8   :  { %794 = vrot.lane.b32.xlu1 %v3838_v10, %s3069_s30  ;;  %729 = vrot.lane.b32.xlu0 %v426_v8, %s3067_s29  ;;  %v3949_v26 = vpop.f32.mrb[0].mxu1 }
 0x1a9   :  { %v3951_v46 = vpop.f32.mrb[1].mxu1 }
 0x1aa   :  { %v523_v47 = vpop.permute.xlu1 %522  ;;  %v592_v44 = vpop.permute.xlu0 %591 }
 0x1ab   :  { %v1262_v45 = vpop.f32.mrb[2].mxu1  ;;  %v617_v13 = vsel %vm605_vm6, %v590_v40, %v592_v44  ;;  %v1065_v11 = vsel %vm817_vm3, %v527_v5, %v592_v44  ;;  %v551_v15 = vsel %vm540_vm8, %v523_v47, %v525_v33 }
 0x1ac   :  { %798 = vrot.lane.b32.xlu1 %v3846_v35, %s3069_s30  ;;  %796 = vrot.lane.b32.xlu0 %v3888_v4, %s3069_s30  ;;  %v1263_v28 = vpop.f32.mrb[3].mxu1  ;;  %v1062_v48 = vsel %vm817_vm3, %v552_v58, %v617_v13 }
 0x1ae   :  { %v655_v51 = vpop.permute.xlu1 %654  ;;  %v588_v52 = vpop.permute.xlu0 %587 }
 0x1af   :  { %v616_v7 = vsel %vm605_vm6, %v588_v52, %v590_v40 }
 0x1b0   :  { %1208 = vperm.xlu0 %2882, %v1205_v32   ;;  %v1059_v16 = vsel %vm817_vm3, %v551_v15, %v616_v7 }
 0x1b2   :  { %v653_v55 = vpop.permute.xlu1 %652  ;;  %v657_v42 = vpop.permute.xlu0 %656 }
 0x1b3   :  { %v682_v41 = vsel %vm670_vm7, %v655_v51, %v657_v42  ;;  %v1119_v60 = vsel %vm890_vm5, %v1065_v11, %v657_v42  ;;  %v681_v12 = vsel %vm670_vm7, %v653_v55, %v655_v51 }
 0x1b4   :  { %v3962_v49 = vpop.f32.mrb[4].mxu1  ;;  %v1117_v6 = vsel %vm890_vm5, %v1062_v48, %v682_v41  ;;  %v1115_v24 = vsel %vm890_vm5, %v1059_v16, %v681_v12 }
 0x1b5   :  { %v2778_v43 = vpop.f32.mrb[5].mxu1 }
 0x1b6   :  { %v722_v62 = vpop.permute.xlu1 %721  ;;  %v720_v0 = vpop.permute.xlu0 %719 }
 0x1b7   :  { %v1184_v8 = vsel %vm939_vm4, %v1119_v60, %v722_v62  ;;  %v747_v9 = vsel %vm735_vm9, %v720_v0, %v722_v62  ;;  %v1302_v27 = vpop.f32.mrb[6].mxu1 }
 0x1b8   :  { %2823 = vmatpush3.bf16.msra.mxu1 %v1184_v8  ;;  %v1181_v1 = vsel %vm939_vm4, %v1117_v6, %v747_v9  ;;  %v2779_v14 = vpop.f32.mrb[7].mxu1 }
 0x1b9   :  { %1782 = vmatprep.subr.bf16.mxu0 %v1181_v1  ;;  %2824 = vmatprep.subr.bf16.mxu1 %v3070_v57 }
 0x1ba   :  { %v783_v34 = vpop.permute.xlu1 %782  ;;  %v718_v63 = vpop.permute.xlu0 %717 }
 0x1bb   :  { %v746_v54 = vsel %vm735_vm9, %v718_v63, %v720_v0 }
 0x1bc   :  { %v1178_v61 = vsel %vm939_vm4, %v1115_v24, %v746_v54 }
 0x1bd   :  { %1783 = vmatpush1.bf16.msra.mxu0 %v1178_v61 }
 0x1be   :  { %v787_v3 = vpop.permute.xlu1 %786  ;;  %v785_v56 = vpop.permute.xlu0 %784 }
 0x1bf   :  { %v1778_v23 = vsel %vm817_vm3, %v787_v3, 0  ;;  %v811_v18 = vsel %vm800_vm10, %v783_v34, %v785_v56  ;;  %v812_v25 = vsel %vm800_vm10, %v785_v56, %v787_v3 }
 0x1c0   :  { %v1772_v21 = vsel %vm817_vm3, %v811_v18, 0  ;;  %2643 = vmatprep.subr.msk.bf16.mxu0 %vm817_vm3, %v812_v25  ;;  %2825 = vmatpush3.bf16.msra.mxu1 %v1778_v23 }
 0x1c1   :  { %1785 = vmatpush1.bf16.msra.mxu0 %v1772_v21  ;;  %2830 = vmatprep.subr.bf16.mxu1 %v3070_v57 }
 0x1c2   :  { %v314_v2 = vpop.permute.xlu1 %313  ;;  %v312_v29 = vpop.permute.xlu0 %311 }
 0x1c3   :  { %2827 = vmatmul.mubr.msk.bf16.vlgmr.msra.gmra.mrb[28].mxu1 %vm1211_vm11, %v3989_v30  ;;  %v335_v33 = vsel %vm321_vm0, %v312_v29, %v314_v2  ;;  %v880_v37 = vsel %vm817_vm3, %v3727_v20, %v314_v2 }
 0x1c4   :  { %2644 = vmatmul.mubr.msk.bf16.vlgmr.msra.gmra.mrb[12].mxu0 %vm1211_vm11, %v3989_v30  ;;  %2836 = vmatprep.mubr.msk.bf16.mxu1 %vm3071_vm12, %v3070_v57  ;;  %v877_v38 = vsel %vm817_vm3, %v3769_v50, %v335_v33 }
 0x1c5   :  { %1923 = vmatprep.mubr.bf16.mxu0 %v3068_v19 }
 0x1c6   :  { %v393_v22 = vpop.permute.xlu1 %392  ;;  %v310_v31 = vpop.permute.xlu0 %309 }
 0x1c7   :  { %v334_v47 = vsel %vm321_vm0, %v310_v31, %v312_v29 }
 0x1c8   :  { %v874_v50 = vsel %vm817_vm3, %v3719_v53, %v334_v47 }
 0x1ca   :  { %v391_v59 = vpop.permute.xlu1 %390  ;;  %v395_v17 = vpop.permute.xlu0 %394 }
 0x1cb   :  { %v416_v36 = vsel %vm402_vm2, %v393_v22, %v395_v17  ;;  %v932_v39 = vsel %vm890_vm5, %v880_v37, %v395_v17  ;;  %v415_v32 = vsel %vm402_vm2, %v391_v59, %v393_v22 }
 0x1cc   :  { %v930_v28 = vsel %vm890_vm5, %v877_v38, %v416_v36  ;;  %v928_v55 = vsel %vm890_vm5, %v874_v50, %v415_v32 }
 0x1ce   :  { %v468_v40 = vpop.permute.xlu1 %467  ;;  %v466_v5 = vpop.permute.xlu0 %465 }
 0x1cf   :  { %v1001_v44 = vsel %vm939_vm4, %v932_v39, %v468_v40  ;;  %v489_v45 = vsel %vm475_vm1, %v466_v5, %v468_v40 }
 0x1d0   :  { %2831 = vmatpush3.bf16.msra.mxu1 %v1001_v44  ;;  %v998_v20 = vsel %vm939_vm4, %v930_v28, %v489_v45 }
 0x1d1   :  { %1891 = vmatprep.subr.bf16.mxu0 %v998_v20  ;;  %2832 = vmatprep.subr.bf16.mxu1 %v3070_v57 }
 0x1d2   :  { %v531_v51 = vpop.permute.xlu1 %530  ;;  %v464_v52 = vpop.permute.xlu0 %463 }
 0x1d3   :  { %v488_v42 = vsel %vm475_vm1, %v464_v52, %v466_v5 }
 0x1d4   :  { %v995_v13 = vsel %vm939_vm4, %v928_v55, %v488_v42 }
 0x1d5   :  { %1892 = vmatpush1.bf16.msra.mxu0 %v995_v13 }
 0x1d6   :  { %v596_v41 = vpop.permute.xlu1 %595  ;;  %v533_v58 = vpop.permute.xlu0 %532 }
 0x1d7   :  { %v554_v1 = vsel %vm540_vm8, %v531_v51, %v533_v58 }
 0x1d8   :  { %v4017_v11 = vpop.f32.mrb[8].mxu1 }
 0x1d9   :  { %v4019_v43 = vpop.f32.mrb[9].mxu1 }
 0x1da   :  { %v529_v48 = vpop.permute.xlu1 %528  ;;  %v598_v60 = vpop.permute.xlu0 %597 }
 0x1db   :  { %v1374_v62 = vpop.f32.mrb[10].mxu1  ;;  %v619_v6 = vsel %vm605_vm6, %v596_v41, %v598_v60  ;;  %v1074_v14 = vsel %vm817_vm3, %v533_v58, %v598_v60  ;;  %v553_v2 = vsel %vm540_vm8, %v529_v48, %v531_v51 }
 0x1dc   :  { %v1375_v0 = vpop.f32.mrb[11].mxu1  ;;  %v1071_v16 = vsel %vm817_vm3, %v554_v1, %v619_v6 }
 0x1de   :  { %v661_v53 = vpop.permute.xlu1 %660  ;;  %v594_v7 = vpop.permute.xlu0 %593 }
 0x1df   :  { %v618_v54 = vsel %vm605_vm6, %v594_v7, %v596_v41 }
 0x1e0   :  { %v1068_v29 = vsel %vm817_vm3, %v553_v2, %v618_v54 }
 0x1e2   :  { %v659_v8 = vpop.permute.xlu1 %658  ;;  %v663_v9 = vpop.permute.xlu0 %662 }
 0x1e3   :  { %v684_v27 = vsel %vm670_vm7, %v661_v53, %v663_v9  ;;  %v1125_v34 = vsel %vm890_vm5, %v1074_v14, %v663_v9  ;;  %v683_v18 = vsel %vm670_vm7, %v659_v8, %v661_v53 }
 0x1e4   :  { %v4023_v12 = vpop.f32.mrb[12].mxu1  ;;  %v1123_v56 = vsel %vm890_vm5, %v1071_v16, %v684_v27  ;;  %v1121_v59 = vsel %vm890_vm5, %v1068_v29, %v683_v18 }
 0x1e5   :  { %v2788_v15 = vpop.f32.mrb[13].mxu1 }
 0x1e6   :  { %v728_v63 = vpop.permute.xlu1 %727  ;;  %v726_v24 = vpop.permute.xlu0 %725 }
 0x1e7   :  { %v1193_v61 = vsel %vm939_vm4, %v1125_v34, %v728_v63  ;;  %v749_v3 = vsel %vm735_vm9, %v726_v24, %v728_v63  ;;  %v1414_v23 = vpop.f32.mrb[14].mxu1 }
 0x1e8   :  { %2833 = vmatpush3.bf16.msra.mxu1 %v1193_v61  ;;  %v1190_v25 = vsel %vm939_vm4, %v1123_v56, %v749_v3  ;;  %v2789_v21 = vpop.f32.mrb[15].mxu1 }
 0x1e9   :  { %1893 = vmatprep.subr.bf16.mxu0 %v1190_v25  ;;  %2834 = vmatprep.subr.bf16.mxu1 %v3070_v57 }
 0x1ea   :  { %v789_v22 = vpop.permute.xlu1 %788  ;;  %v724_v31 = vpop.permute.xlu0 %723 }
 0x1eb   :  { %v748_v17 = vsel %vm735_vm9, %v724_v31, %v726_v24 }
 0x1ec   :  { %v1187_v33 = vsel %vm939_vm4, %v1121_v59, %v748_v17 }
 0x1ed   :  { %1894 = vmatpush1.bf16.msra.mxu0 %v1187_v33 }
 0x1ee   :  { %v793_v36 = vpop.permute.xlu1 %792  ;;  %v791_v37 = vpop.permute.xlu0 %790 }
 0x1ef   :  { %v1889_v38 = vsel %vm817_vm3, %v793_v36, 0  ;;  %v813_v39 = vsel %vm800_vm10, %v789_v22, %v791_v37  ;;  %v814_v40 = vsel %vm800_vm10, %v791_v37, %v793_v36 }
 0x1f0   :  { %v1883_v5 = vsel %vm817_vm3, %v813_v39, 0  ;;  %2649 = vmatprep.subr.msk.bf16.mxu0 %vm817_vm3, %v814_v40  ;;  %2835 = vmatpush3.bf16.msra.mxu1 %v1889_v38 }
 0x1f1   :  { %1896 = vmatpush1.bf16.msra.mxu0 %v1883_v5  ;;  %2840 = vmatprep.subr.bf16.mxu1 %v3070_v57 }
 0x1f2   :  { %v320_v47 = vpop.permute.xlu1 %319  ;;  %v318_v44 = vpop.permute.xlu0 %317 }
 0x1f3   :  { %2837 = vmatmul.mubr.msk.bf16.vlgmr.msra.gmra.mrb[32].mxu1 %vm1211_vm11, %v3989_v30  ;;  %v337_v50 = vsel %vm321_vm0, %v318_v44, %v320_v47  ;;  %v889_v52 = vsel %vm817_vm3, %v3846_v35, %v320_v47 }
 0x1f4   :  { %2650 = vmatmul.mubr.msk.bf16.vlgmr.msra.gmra.mrb[16].mxu0 %vm1211_vm11, %v3989_v30  ;;  %2846 = vmatprep.mubr.msk.bf16.mxu1 %vm3071_vm12, %v3070_v57  ;;  %v886_v55 = vsel %vm817_vm3, %v3888_v4, %v337_v50  ;;  %v2915_v50 = vld [vmem:[#allocation6 + $0x80] sm:$0xff]  }
 0x1f5   :  { %2034 = vmatprep.mubr.bf16.mxu0 %v3068_v19 }
 0x1f6   :  { %v399_v45 = vpop.permute.xlu1 %398  ;;  %v316_v28 = vpop.permute.xlu0 %315 }
 0x1f7   :  { %v336_v19 = vsel %vm321_vm0, %v316_v28, %v318_v44 }
 0x1f8   :  { %v883_v4 = vsel %vm817_vm3, %v3838_v10, %v336_v19  ;;  %v2900_v19 = vld [vmem:[#allocation6] sm:$0xff]  }
 0x1fa   :  { %v397_v32 = vpop.permute.xlu1 %396  ;;  %v401_v20 = vpop.permute.xlu0 %400 }
 0x1fb   :  { %v418_v51 = vsel %vm402_vm2, %v399_v45, %v401_v20  ;;  %v938_v42 = vsel %vm890_vm5, %v889_v52, %v401_v20  ;;  %v417_v62 = vsel %vm402_vm2, %v397_v32, %v399_v45 }
 0x1fc   :  { %v936_v60 = vsel %vm890_vm5, %v886_v55, %v418_v51  ;;  %v934_v7 = vsel %vm890_vm5, %v883_v4, %v417_v62  ;;  %v2899_v55 = vld [vmem:[#allocation6 + $0x40] sm:$0xff]   ;;  %v2904_v4 = vld [vmem:[#allocation6 + $0x10] sm:$0xff]  }
 0x1fe   :  { %v474_v13 = vpop.permute.xlu1 %473  ;;  %v472_v41 = vpop.permute.xlu0 %471 }
 0x1ff   :  { %v1010_v58 = vsel %vm939_vm4, %v938_v42, %v474_v13  ;;  %v491_v48 = vsel %vm475_vm1, %v472_v41, %v474_v13 }
 0x200   :  { %2841 = vmatpush3.bf16.msra.mxu1 %v1010_v58  ;;  %v1007_v35 = vsel %vm939_vm4, %v936_v60, %v491_v48  ;;  %v2916_v58 = vld [vmem:[#allocation6 + $0x88] sm:$0x7f]  }
 0x201   :  { %2002 = vmatprep.subr.bf16.mxu0 %v1007_v35  ;;  %2842 = vmatprep.subr.bf16.mxu1 %v3070_v57  ;;  %v2901_v48 = vld [vmem:[#allocation6 + $0x48] sm:$0xff]   ;;  %v2298_v62 = vsel %vm2296_vm13, %v2916_v58, 0  ;;  %v2903_v35 = vld [vmem:[#allocation6 + $0x50] sm:$0xff]  }
 0x202   :  { %v537_v0 = vpop.permute.xlu1 %536  ;;  %v470_v53 = vpop.permute.xlu0 %469  ;;  %v2902_v60 = vld [vmem:[#allocation6 + $0x8] sm:$0xff]  }
 0x203   :  { %v490_v8 = vsel %vm475_vm1, %v470_v53, %v472_v41  ;;  %v2906_v53 = vld [vmem:[#allocation6 + $0x18] sm:$0xff]  }
 0x204   :  { %v1004_v9 = vsel %vm939_vm4, %v934_v7, %v490_v8  ;;  %v2907_v7 = vld [vmem:[#allocation6 + $0x60] sm:$0xff]  }
 0x205   :  { %2003 = vmatpush1.bf16.msra.mxu0 %v1004_v9 }
 0x206   :  { %v602_v6 = vpop.permute.xlu1 %601  ;;  %v539_v27 = vpop.permute.xlu0 %538 }
 0x207   :  { %v556_v2 = vsel %vm540_vm8, %v537_v0, %v539_v27 }
 0x208   :  { %v4073_v1 = vpop.f32.mrb[0].mxu0  ;;  %v4075_v14 = vpop.f32.mrb[16].mxu1 }
 0x209   :  { %v4077_v15 = vpop.f32.mrb[1].mxu0  ;;  %v2798_v16 = vpop.f32.mrb[17].mxu1 }
 0x20a   :  { %v535_v34 = vpop.permute.xlu1 %534  ;;  %v604_v10 = vpop.permute.xlu0 %603  ;;  %v2908_v16 = vld [vmem:[#allocation6 + $0x20] sm:$0xff]  }
 0x20b   :  { %v1485_v63 = vpop.f32.mrb[2].mxu0  ;;  %v1525_v24 = vpop.f32.mrb[18].mxu1  ;;  %v621_v25 = vsel %vm605_vm6, %v602_v6, %v604_v10  ;;  %v1083_v29 = vsel %vm817_vm3, %v539_v27, %v604_v10  ;;  %v555_v5 = vsel %vm540_vm8, %v535_v34, %v537_v0  ;;  %v2905_v0 = vld [vmem:[#allocation6 + $0x58] sm:$0xff]  }
 0x20c   :  { %v1486_v54 = vpop.f32.mrb[3].mxu0  ;;  %v2799_v61 = vpop.f32.mrb[19].mxu1  ;;  %v1080_v22 = vsel %vm817_vm3, %v556_v2, %v621_v25 }
 0x20e   :  { %v667_v3 = vpop.permute.xlu1 %666  ;;  %v600_v56 = vpop.permute.xlu0 %599 }
 0x20f   :  { %v620_v33 = vsel %vm605_vm6, %v600_v56, %v602_v6 }
 0x210   :  { %v1077_v47 = vsel %vm817_vm3, %v555_v5, %v620_v33 }
 0x212   :  { %v665_v23 = vpop.permute.xlu1 %664  ;;  %v669_v18 = vpop.permute.xlu0 %668 }
 0x213   :  { %v686_v21 = vsel %vm670_vm7, %v667_v3, %v669_v18  ;;  %v1131_v31 = vsel %vm890_vm5, %v1083_v29, %v669_v18  ;;  %v685_v39 = vsel %vm670_vm7, %v665_v23, %v667_v3  ;;  %v2910_v23 = vld [vmem:[#allocation6 + $0x28] sm:$0xff]  }
 0x214   :  { %v1129_v38 = vsel %vm890_vm5, %v1080_v22, %v686_v21  ;;  %v1127_v28 = vsel %vm890_vm5, %v1077_v47, %v685_v39 }
 0x216   :  { %v734_v59 = vpop.permute.xlu1 %733  ;;  %v732_v17 = vpop.permute.xlu0 %731 }
 0x217   :  { %v1202_v36 = vsel %vm939_vm4, %v1131_v31, %v734_v59  ;;  %v751_v37 = vsel %vm735_vm9, %v732_v17, %v734_v59 }
 0x218   :  { %2843 = vmatpush3.bf16.msra.mxu1 %v1202_v36  ;;  %v1199_v40 = vsel %vm939_vm4, %v1129_v38, %v751_v37  ;;  %v2912_v36 = vld [vmem:[#allocation6 + $0x30] sm:$0xff]  }
 0x219   :  { %2004 = vmatprep.subr.bf16.mxu0 %v1199_v40  ;;  %2844 = vmatprep.subr.bf16.mxu1 %v3070_v57  ;;  %v2913_v40 = vld [vmem:[#allocation6 + $0x78] sm:$0xff]  }
 0x21a   :  { %v795_v44 = vpop.permute.xlu1 %794  ;;  %v730_v45 = vpop.permute.xlu0 %729 }
 0x21b   :  { %v750_v32 = vsel %vm735_vm9, %v730_v45, %v732_v17 }
 0x21c   :  { %v1196_v20 = vsel %vm939_vm4, %v1127_v28, %v750_v32 }
 0x21d   :  { %2005 = vmatpush1.bf16.msra.mxu0 %v1196_v20 }
 0x21e   :  { %v799_v51 = vpop.permute.xlu1 %798  ;;  %v797_v52 = vpop.permute.xlu0 %796 }
 0x21f   :  { %v2000_v42 = vsel %vm817_vm3, %v799_v51, 0  ;;  %v815_v13 = vsel %vm800_vm10, %v795_v44, %v797_v52  ;;  %v816_v57 = vsel %vm800_vm10, %v797_v52, %v799_v51 }
 0x220   :  { %v1994_v41 = vsel %vm817_vm3, %v815_v13, 0  ;;  %2655 = vmatprep.subr.msk.bf16.mxu0 %vm817_vm3, %v816_v57  ;;  %2845 = vmatpush3.bf16.msra.mxu1 %v2000_v42 }
 0x221   :  { %2007 = vmatpush1.bf16.msra.mxu0 %v1994_v41  ;;  %2850 = vmatprep.subr.bf16.mxu1 %v2915_v50 }
 0x222   :  { %2724 = vmatprep.subr.bf16.mxu0 %v2899_v55  ;;  %v2914_v55 = vld [vmem:[#allocation6 + $0x38] sm:$0xff]  }
 0x223   :  { %2847 = vmatmul.mubr.msk.bf16.vlgmr.msra.gmra.mrb[36].mxu1 %vm1211_vm11, %v3989_v30 }
 0x224   :  { %2656 = vmatmul.mubr.msk.bf16.vlgmr.msra.gmra.mrb[20].mxu0 %vm1211_vm11, %v3989_v30  ;;  %2851 = vmatpush3.bf16.msra.mxu1 %v2915_v50 }
 0x225   :  { %2725 = vmatpush3.bf16.msra.mxu0 %v2900_v19  ;;  %2862 = vmatprep.subr.msk.bf16.mxu1 %vm2296_vm13, %v2916_v58 }
 0x226   :  { %2726 = vmatprep.subr.bf16.mxu0 %v2901_v48 }
 0x228   :  { %2853 = vmatpush3.bf16.msra.mxu1 %v2298_v62 }
 0x229   :  { %2727 = vmatpush3.bf16.msra.mxu0 %v2902_v60 }
 0x22a   :  { %2728 = vmatprep.subr.bf16.mxu0 %v2903_v35 }
 0x22d   :  { %2729 = vmatpush3.bf16.msra.mxu0 %v2904_v4 }
 0x22e   :  { %2730 = vmatprep.subr.bf16.mxu0 %v2905_v0 }
 0x22f   :  { %v4106_v8 = vpop.permute.xlu0 %1208 }
 0x230   :  { %v4110_v30 = vadd.f32 %v4023_v12, %v4106_v8  ;;  %v4114_v9 = vadd.f32 %v4073_v1, %v4106_v8  ;;  %v4118_v6 = vadd.f32 %v4077_v15, %v4106_v8  ;;  %v4122_v27 = vadd.f32 %v4075_v14, %v4106_v8  ;;  %v2909_v15 = vld [vmem:[#allocation6 + $0x68] sm:$0xff]  }
 0x231   :  { %2731 = vmatpush3.bf16.msra.mxu0 %v2906_v53  ;;  %v4126_v34 = vadd.f32 %v3951_v46, %v4106_v8  ;;  %v4130_v12 = vadd.f32 %v4019_v43, %v4106_v8  ;;  %v4136_v14 = vadd.f32 %v3949_v26, %v4106_v8  ;;  %v4142_v46 = vadd.f32 %v4017_v11, %v4106_v8  ;;  %v2911_v26 = vld [vmem:[#allocation6 + $0x70] sm:$0xff]  }
 0x232   :  { %v1422_v1 = vmin.f32 %v4110_v30, 0.0  ;;  %v1531_v10 = vmin.f32 %v4114_v9, 0.0  ;;  %2732 = vmatprep.subr.bf16.mxu0 %v2907_v7  ;;  %v1532_v63 = vmin.f32 %v4118_v6, 0.0  ;;  %v1533_v24 = vmin.f32 %v4122_v27, 0.0 }
 0x233   :  { %v1309_v61 = vmin.f32 %v4126_v34, 0.0  ;;  %v1421_v18 = vmin.f32 %v4130_v12, 0.0  ;;  %v1308_v21 = vmin.f32 %v4136_v14, 0.0  ;;  %v1420_v11 = vmin.f32 %v4142_v46, 0.0 }
 0x234   :  { %v1427_v43 = vmul.f32 1.442695, %v1422_v1  ;;  %v1534_v54 = vmul.f32 1.442695, %v1531_v10  ;;  %v1536_v3 = vmul.f32 1.442695, %v1532_v63  ;;  %v4150_v31 = vadd.f32 %v3962_v49, %v4106_v8 }
 0x235   :  { %v1538_v56 = vmul.f32 1.442695, %v1533_v24  ;;  %2733 = vmatpush3.bf16.msra.mxu0 %v2908_v16  ;;  %v1313_v25 = vmul.f32 1.442695, %v1309_v61  ;;  %v1425_v22 = vmul.f32 1.442695, %v1421_v18 }
 0x236   :  { %2917 = vpow2.f32 %v1427_v43  ;;  %2734 = vmatprep.subr.bf16.mxu0 %v2909_v15  ;;  %v1311_v37 = vmul.f32 1.442695, %v1308_v21  ;;  %v1423_v49 = vmul.f32 1.442695, %v1420_v11  ;;  %v1310_v5 = vmin.f32 %v4150_v31, 0.0 }
 0x237   :  { %2919 = vpow2.f32 %v1534_v54  ;;  %vm1419_vm14 = vcmp.gt.f32.partialorder %v4110_v30, 0.0  ;;  %vm1528_vm0 = vcmp.gt.f32.partialorder %v4114_v9, 0.0  ;;  %vm1529_vm1 = vcmp.gt.f32.partialorder %v4118_v6, 0.0 }
 0x238   :  { %2921 = vpow2.f32 %v1536_v3  ;;  %v1592_v2 = vpop.f32.mrb[4].mxu0  ;;  %v1633_v29 = vpop.f32.mrb[20].mxu1  ;;  %v1315_v13 = vmul.f32 1.442695, %v1310_v5  ;;  %vm1530_vm2 = vcmp.gt.f32.partialorder %v4122_v27, 0.0  ;;  %vm1306_vm3 = vcmp.gt.f32.partialorder %v4126_v34, 0.0 }
 0x239   :  { %2923 = vpow2.f32 %v1538_v56  ;;  %v4153_v59 = vadd.f32 %v1592_v2, %v4106_v8  ;;  %v1594_v17 = vpop.f32.mrb[5].mxu0  ;;  %v4156_v33 = vadd.f32 %v1633_v29, %v4106_v8  ;;  %2735 = vmatpush3.bf16.msra.mxu0 %v2910_v23  ;;  %v2808_v38 = vpop.f32.mrb[21].mxu1  ;;  %vm1418_vm4 = vcmp.gt.f32.partialorder %v4130_v12, 0.0 }
 0x23a   :  { %v4159_v39 = vadd.f32 %v1594_v17, %v4106_v8  ;;  %2736 = vmatprep.subr.bf16.mxu0 %v2911_v26  ;;  %2925 = vpow2.f32 %v1313_v25  ;;  %v1596_v47 = vpop.f32.mrb[6].mxu0  ;;  %v1636_v44 = vpop.f32.mrb[22].mxu1  ;;  %vm1305_vm5 = vcmp.gt.f32.partialorder %v4136_v14, 0.0  ;;  %vm1417_vm6 = vcmp.gt.f32.partialorder %v4142_v46, 0.0 }
 0x23b   :  { %v1642_v45 = vmin.f32 %v4153_v59, 0.0  ;;  %v1644_v28 = vmin.f32 %v4156_v33, 0.0  ;;  %v1597_v32 = vpop.f32.mrb[7].mxu0  ;;  %v2809_v20 = vpop.f32.mrb[23].mxu1  ;;  %2927 = vpow2.f32 %v1425_v22  ;;  %vm1639_vm7 = vcmp.gt.f32.partialorder %v4153_v59, 0.0 }
 0x23c   :  { %v1643_v50 = vmin.f32 %v4159_v39, 0.0  ;;  %2929 = vpow2.f32 %v1311_v37  ;;  %vm1640_vm8 = vcmp.gt.f32.partialorder %v4159_v39, 0.0  ;;  %vm1641_vm9 = vcmp.gt.f32.partialorder %v4156_v33, 0.0 }
 0x23d   :  { %v1645_v51 = vmul.f32 1.442695, %v1642_v45  ;;  %v1649_v52 = vmul.f32 1.442695, %v1644_v28  ;;  %2737 = vmatpush3.bf16.msra.mxu0 %v2912_v36  ;;  %2931 = vpow2.f32 %v1423_v49  ;;  %vm1307_vm10 = vcmp.gt.f32.partialorder %v4150_v31, 0.0 }
 0x23e   :  { %v1647_v42 = vmul.f32 1.442695, %v1643_v50  ;;  %2738 = vmatprep.subr.bf16.mxu0 %v2913_v40 }
 0x23f   :  { %2933 = vpow2.f32 %v1645_v51 }
 0x240   :  { %v2918_v57 = vpop.eup %2917  ;;  %2935 = vpow2.f32 %v1647_v42 }
 0x241   :  { %v2920_v41 = vpop.eup %2919  ;;  %v2624_v19 = vadd.f32 -1.0, %v2918_v57  ;;  %2937 = vpow2.f32 %v1649_v52  ;;  %2739 = vmatpush3.bf16.msra.mxu0 %v2914_v55 }
 0x242   :  { %v2922_v58 = vpop.eup %2921  ;;  %v2628_v48 = vadd.f32 -1.0, %v2920_v41  ;;  %2939 = vpow2.f32 %v1315_v13 }
 0x243   :  { %v2924_v60 = vpop.eup %2923  ;;  %v1434_v62 = vsel %vm1419_vm14, %v4110_v30, %v2624_v19  ;;  %v2629_v35 = vadd.f32 -1.0, %v2922_v58 }
 0x244   :  { %v2926_v4 = vpop.eup %2925  ;;  %1437 = vst.msk [vmem:[#allocation2 + $0x28] sm:$0xff] %vm1325_vm15, %v1434_v62  ;;  %v1543_v0 = vsel %vm1528_vm0, %v4114_v9, %v2628_v48  ;;  %v2630_v53 = vadd.f32 -1.0, %v2924_v60 }
 0x245   :  { %v1544_v7 = vsel %vm1529_vm1, %v4118_v6, %v2629_v35  ;;  %v2617_v16 = vadd.f32 -1.0, %v2926_v4  ;;  %v2928_v1 = vpop.eup %2927 }
 0x246   :  { %v1545_v10 = vsel %vm1530_vm2, %v4122_v27, %v2630_v53  ;;  %v2930_v30 = vpop.eup %2929  ;;  %v2623_v63 = vadd.f32 -1.0, %v2928_v1 }
 0x247   :  { %1548 = vst.msk [vmem:[#allocation2 + $0x40] sm:$0xff] %vm1325_vm15, %v1545_v10  ;;  %v1321_v15 = vsel %vm1306_vm3, %v4126_v34, %v2617_v16  ;;  %v2932_v9 = vpop.eup %2931  ;;  %v2616_v24 = vadd.f32 -1.0, %v2930_v30 }
 0x248   :  { %v1433_v6 = vsel %vm1418_vm4, %v4130_v12, %v2623_v63  ;;  %v2622_v27 = vadd.f32 -1.0, %v2932_v9 }
 0x249   :  { %v2934_v43 = vpop.eup %2933  ;;  %v2129_v3 = vpack.c.bf16 %v1433_v6, %v1321_v15  ;;  %v1320_v34 = vsel %vm1305_vm5, %v4136_v14, %v2616_v24 }
 0x24a   :  { %v2936_v54 = vpop.eup %2935  ;;  %v2634_v61 = vadd.f32 -1.0, %v2934_v43  ;;  %v1432_v18 = vsel %vm1417_vm6, %v4142_v46, %v2622_v27 }
 0x24b   :  { %v2938_v56 = vpop.eup %2937  ;;  %v2635_v23 = vadd.f32 -1.0, %v2936_v54  ;;  %2332 = vmatprep.mubr.bf16.mxu0 %v2129_v3  ;;  %v2128_v12 = vpack.c.bf16 %v1432_v18, %v1320_v34  ;;  %v2109_v17 = vld [vmem:[#allocation2 + $0x28] sm:$0xff] }
 0x24c   :  { %v2940_v26 = vpop.eup %2939  ;;  %v1654_v25 = vsel %vm1639_vm7, %v4153_v59, %v2634_v61  ;;  %v2636_v21 = vadd.f32 -1.0, %v2938_v56 }
 0x24d   :  { %v1655_v11 = vsel %vm1640_vm8, %v4159_v39, %v2635_v23  ;;  %v2618_v2 = vadd.f32 -1.0, %v2940_v26  ;;  %v2131_v29 = vpack.c.bf16 %v1654_v25, %v1543_v0  ;;  %2333 = vmatmul.mubr.bf16.vlgmr.msra.gmra.mrb[24].mxu0 %v2128_v12 }
 0x24e   :  { %v1656_v14 = vsel %vm1641_vm9, %v4156_v33, %v2636_v21  ;;  %v2132_v22 = vpack.c.bf16 %v1655_v11, %v1544_v7  ;;  %v2112_v59 = vld [vmem:[#allocation2 + $0x40] sm:$0xff] }
 0x24f   :  { %1659 = vst.msk [vmem:[#allocation2 + $0x58] sm:$0xff] %vm1325_vm15, %v1656_v14  ;;  %v1322_v46 = vsel %vm1307_vm10, %v4150_v31, %v2618_v2 }
 0x250   :  { %2340 = vmatprep.mubr.bf16.mxu0 %v2132_v22  ;;  %1326 = vst.msk [vmem:[#allocation2 + $0x10] sm:$0xff] %vm1325_vm15, %v1322_v46 }
 0x255   :  { %2341 = vmatmul.mubr.bf16.gmra.mrb[28].mxu0 %v2131_v29 }
 0x256   :  { %v2115_v36 = vld [vmem:[#allocation2 + $0x58] sm:$0xff] }
 0x257   :  { %v2106_v37 = vld [vmem:[#allocation2 + $0x10] sm:$0xff]  ;;  %v2133_v38 = vpack.c.bf16 %v2115_v36, %v2112_v59 }
 0x258   :  { %v2130_v39 = vpack.c.bf16 %v2109_v17, %v2106_v37 }
 0x25a   :  { %2854 = vmatprep.mubr.msk.bf16.mxu1 %vm1325_vm15, %v2130_v39 }
 0x25b   :  { %2855 = vmatmul.mubr.msk.bf16.vlgmr.msra.gmra.mrb[40].mxu1 %vm1325_vm15, %v2133_v38 }
 0x268   :  { %v1703_v33 = vpop.f32.mrb[8].mxu0  ;;  %v1744_v40 = vpop.f32.mrb[24].mxu1 }
 0x269   :  { %v1704_v49 = vadd.f32 %v1703_v33, %v4106_v8  ;;  %v1705_v5 = vpop.f32.mrb[9].mxu0  ;;  %v1745_v31 = vadd.f32 %v1744_v40, %v4106_v8  ;;  %v2818_v47 = vpop.f32.mrb[25].mxu1 }
 0x26a   :  { %v1706_v44 = vadd.f32 %v1705_v5, %v4106_v8  ;;  %v1707_v45 = vpop.f32.mrb[10].mxu0  ;;  %v1747_v28 = vpop.f32.mrb[26].mxu1 }
 0x26b   :  { %v1753_v32 = vmin.f32 %v1704_v49, 0.0  ;;  %v1708_v20 = vpop.f32.mrb[11].mxu0  ;;  %v1755_v50 = vmin.f32 %v1745_v31, 0.0  ;;  %v2819_v51 = vpop.f32.mrb[27].mxu1  ;;  %vm1750_vm11 = vcmp.gt.f32.partialorder %v1704_v49, 0.0  ;;  %vm1752_vm13 = vcmp.gt.f32.partialorder %v1745_v31, 0.0 }
 0x26c   :  { %v1754_v52 = vmin.f32 %v1706_v44, 0.0  ;;  %vm1751_vm12 = vcmp.gt.f32.partialorder %v1706_v44, 0.0 }
 0x26d   :  { %v1756_v55 = vmul.f32 1.442695, %v1753_v32  ;;  %v1760_v42 = vmul.f32 1.442695, %v1755_v50 }
 0x26e   :  { %v1758_v13 = vmul.f32 1.442695, %v1754_v52 }
 0x26f   :  { %2941 = vpow2.f32 %v1756_v55 }
 0x270   :  { %2943 = vpow2.f32 %v1758_v13 }
 0x271   :  { %2945 = vpow2.f32 %v1760_v42 }
 0x279   :  { %v2942_v57 = vpop.eup %2941 }
 0x27a   :  { %v2944_v41 = vpop.eup %2943  ;;  %v2640_v19 = vadd.f32 -1.0, %v2942_v57 }
 0x27b   :  { %v2946_v58 = vpop.eup %2945  ;;  %v2641_v48 = vadd.f32 -1.0, %v2944_v41 }
 0x27c   :  { %v1765_v60 = vsel %vm1750_vm11, %v1704_v49, %v2640_v19  ;;  %v2642_v62 = vadd.f32 -1.0, %v2946_v58  ;;  %vm2575_vm11 = vcmask 1041409  }
 0x27d   :  { %v1766_v35 = vsel %vm1751_vm12, %v1706_v44, %v2641_v48  ;;  %vm2578_vm12 = vcmask 1042434  }
 0x27e   :  { %v1767_v4 = vsel %vm1752_vm13, %v1745_v31, %v2642_v62  ;;  %vm2581_vm13 = vcmask 1043459  }
 0x27f   :  { %1770 = vst.msk [vmem:[#allocation2 + $0x70] sm:$0xff] %vm1325_vm15, %v1767_v4 }
 0x286   :  { %v2118_v14 = vld [vmem:[#allocation2 + $0x70] sm:$0xff] }
 0x296   :  { %v1855_v0 = vpop.f32.mrb[28].mxu1 }
 0x297   :  { %v1814_v53 = vpop.f32.mrb[12].mxu0  ;;  %v1856_v7 = vadd.f32 %v1855_v0, %v4106_v8  ;;  %v2828_v16 = vpop.f32.mrb[29].mxu1 }
 0x298   :  { %v1815_v1 = vadd.f32 %v1814_v53, %v4106_v8  ;;  %v1816_v10 = vpop.f32.mrb[13].mxu0  ;;  %v1858_v30 = vpop.f32.mrb[30].mxu1 }
 0x299   :  { %v1817_v15 = vadd.f32 %v1816_v10, %v4106_v8  ;;  %v1866_v63 = vmin.f32 %v1856_v7, 0.0  ;;  %v1818_v9 = vpop.f32.mrb[14].mxu0  ;;  %v2829_v24 = vpop.f32.mrb[31].mxu1  ;;  %vm1863_vm14 = vcmp.gt.f32.partialorder %v1856_v7, 0.0 }
 0x29a   :  { %v1864_v43 = vmin.f32 %v1815_v1, 0.0  ;;  %v1819_v6 = vpop.f32.mrb[15].mxu0  ;;  %vm1861_vm0 = vcmp.gt.f32.partialorder %v1815_v1, 0.0 }
 0x29b   :  { %v1865_v27 = vmin.f32 %v1817_v15, 0.0  ;;  %v1871_v54 = vmul.f32 1.442695, %v1866_v63  ;;  %vm1862_vm1 = vcmp.gt.f32.partialorder %v1817_v15, 0.0 }
 0x29c   :  { %v1867_v61 = vmul.f32 1.442695, %v1864_v43 }
 0x29d   :  { %v1869_v3 = vmul.f32 1.442695, %v1865_v27  ;;  %2947 = vpow2.f32 %v1871_v54 }
 0x29e   :  { %2949 = vpow2.f32 %v1867_v61 }
 0x29f   :  { %2951 = vpow2.f32 %v1869_v3 }
 0x2a7   :  { %v2948_v34 = vpop.eup %2947 }
 0x2a8   :  { %v2950_v56 = vpop.eup %2949  ;;  %v2648_v23 = vadd.f32 -1.0, %v2948_v34 }
 0x2a9   :  { %v2952_v18 = vpop.eup %2951  ;;  %v2646_v26 = vadd.f32 -1.0, %v2950_v56 }
 0x2aa   :  { %v2647_v25 = vadd.f32 -1.0, %v2952_v18  ;;  %v1878_v21 = vsel %vm1863_vm14, %v1856_v7, %v2648_v23 }
 0x2ab   :  { %v1876_v12 = vsel %vm1861_vm0, %v1815_v1, %v2646_v26  ;;  %1881 = vst.msk [vmem:[#allocation2 + $0x88] sm:$0xff] %vm1325_vm15, %v1878_v21 }
 0x2ac   :  { %v1877_v11 = vsel %vm1862_vm1, %v1817_v15, %v2647_v25  ;;  %v2134_v2 = vpack.c.bf16 %v1876_v12, %v1765_v60 }
 0x2ad   :  { %v2135_v29 = vpack.c.bf16 %v1877_v11, %v1766_v35 }
 0x2af   :  { %2348 = vmatprep.mubr.bf16.mxu0 %v2135_v29 }
 0x2b0   :  { %2349 = vmatmul.mubr.bf16.gmra.mrb[32].mxu0 %v2134_v2 }
 0x2b2   :  { %v2121_v22 = vld [vmem:[#allocation2 + $0x88] sm:$0xff] }
 0x2b3   :  { %v2136_v46 = vpack.c.bf16 %v2121_v22, %v2118_v14 }
 0x2b5   :  { %2858 = vmatprep.mubr.msk.bf16.mxu1 %vm1325_vm15, %v2136_v46 }
 0x2c6   :  { %v1966_v59 = vpop.f32.mrb[32].mxu1 }
 0x2c7   :  { %v1925_v17 = vpop.f32.mrb[16].mxu0  ;;  %v1967_v36 = vadd.f32 %v1966_v59, %v4106_v8  ;;  %v2838_v37 = vpop.f32.mrb[33].mxu1 }
 0x2c8   :  { %v1926_v38 = vadd.f32 %v1925_v17, %v4106_v8  ;;  %v1927_v39 = vpop.f32.mrb[17].mxu0  ;;  %v1969_v33 = vpop.f32.mrb[34].mxu1 }
 0x2c9   :  { %v1928_v40 = vadd.f32 %v1927_v39, %v4106_v8  ;;  %v1977_v49 = vmin.f32 %v1967_v36, 0.0  ;;  %v1929_v5 = vpop.f32.mrb[18].mxu0  ;;  %v2839_v31 = vpop.f32.mrb[35].mxu1  ;;  %vm1974_vm2 = vcmp.gt.f32.partialorder %v1967_v36, 0.0  ;;  %v4216_v33 = vld [vmem:[%s4258_s4] sm:$0xff] }
 0x2ca   :  { %v1975_v47 = vmin.f32 %v1926_v38, 0.0  ;;  %v1930_v44 = vpop.f32.mrb[19].mxu0  ;;  %vm1972_vm3 = vcmp.gt.f32.partialorder %v1926_v38, 0.0 }
 0x2cb   :  { %v1976_v45 = vmin.f32 %v1928_v40, 0.0  ;;  %v1982_v28 = vmul.f32 1.442695, %v1977_v49  ;;  %vm1973_vm4 = vcmp.gt.f32.partialorder %v1928_v40, 0.0 }
 0x2cc   :  { %v1978_v32 = vmul.f32 1.442695, %v1975_v47 }
 0x2cd   :  { %v1980_v20 = vmul.f32 1.442695, %v1976_v45  ;;  %2953 = vpow2.f32 %v1982_v28 }
 0x2ce   :  { %2955 = vpow2.f32 %v1978_v32 }
 0x2cf   :  { %2957 = vpow2.f32 %v1980_v20 }
 0x2d7   :  { %v2954_v50 = vpop.eup %2953 }
 0x2d8   :  { %v2956_v51 = vpop.eup %2955  ;;  %v2654_v52 = vadd.f32 -1.0, %v2954_v50 }
 0x2d9   :  { %v2958_v55 = vpop.eup %2957  ;;  %v2652_v42 = vadd.f32 -1.0, %v2956_v51 }
 0x2da   :  { %v2653_v13 = vadd.f32 -1.0, %v2958_v55  ;;  %v1989_v57 = vsel %vm1974_vm2, %v1967_v36, %v2654_v52 }
 0x2db   :  { %v1987_v41 = vsel %vm1972_vm3, %v1926_v38, %v2652_v42  ;;  %1992 = vst.msk [vmem:[#allocation2 + $0xa0] sm:$0xff] %vm1325_vm15, %v1989_v57  ;;  %vm2584_vm3 = vcmask 1044484  }
 0x2dc   :  { %v1988_v19 = vsel %vm1973_vm4, %v1928_v40, %v2653_v13  ;;  %vm2587_vm4 = vcmask 1045509  }
 0x2e2   :  { %v2124_v26 = vld [vmem:[#allocation2 + $0xa0] sm:$0xff] }
 0x2f6   :  { %v2077_v58 = vpop.f32.mrb[36].mxu1 }
 0x2f7   :  { %v2078_v48 = vadd.f32 %v2077_v58, %v4106_v8  ;;  %v2036_v60 = vpop.f32.mrb[20].mxu0  ;;  %v2848_v62 = vpop.f32.mrb[37].mxu1 }
 0x2f8   :  { %v2037_v35 = vadd.f32 %v2036_v60, %v4106_v8  ;;  %v2038_v4 = vpop.f32.mrb[21].mxu0  ;;  %v2080_v0 = vpop.f32.mrb[38].mxu1 }
 0x2f9   :  { %v2088_v53 = vmin.f32 %v2078_v48, 0.0  ;;  %v2039_v7 = vadd.f32 %v2038_v4, %v4106_v8  ;;  %v2040_v16 = vpop.f32.mrb[22].mxu0  ;;  %v2849_v1 = vpop.f32.mrb[39].mxu1  ;;  %vm2085_vm5 = vcmp.gt.f32.partialorder %v2078_v48, 0.0 }
 0x2fa   :  { %v2086_v10 = vmin.f32 %v2037_v35, 0.0  ;;  %v2041_v30 = vpop.f32.mrb[23].mxu0  ;;  %vm2083_vm6 = vcmp.gt.f32.partialorder %v2037_v35, 0.0 }
 0x2fb   :  { %v2093_v15 = vmul.f32 1.442695, %v2088_v53  ;;  %v2087_v63 = vmin.f32 %v2039_v7, 0.0  ;;  %vm2084_vm7 = vcmp.gt.f32.partialorder %v2039_v7, 0.0 }
 0x2fc   :  { %v2089_v9 = vmul.f32 1.442695, %v2086_v10 }
 0x2fd   :  { %2959 = vpow2.f32 %v2093_v15  ;;  %v2091_v24 = vmul.f32 1.442695, %v2087_v63 }
 0x2fe   :  { %2961 = vpow2.f32 %v2089_v9 }
 0x2ff   :  { %2963 = vpow2.f32 %v2091_v24 }
 0x307   :  { %v2960_v43 = vpop.eup %2959 }
 0x308   :  { %v2962_v6 = vpop.eup %2961  ;;  %v2660_v27 = vadd.f32 -1.0, %v2960_v43 }
 0x309   :  { %v2964_v54 = vpop.eup %2963  ;;  %v2658_v61 = vadd.f32 -1.0, %v2962_v6 }
 0x30a   :  { %v2100_v3 = vsel %vm2085_vm5, %v2078_v48, %v2660_v27  ;;  %v2659_v8 = vadd.f32 -1.0, %v2964_v54  ;;  %vm2590_vm5 = vcmask 1046534  }
 0x30b   :  { %2103 = vst.msk [vmem:[#allocation2 + $0xb8] sm:$0xff] %vm1325_vm15, %v2100_v3  ;;  %v2098_v34 = vsel %vm2083_vm6, %v2037_v35, %v2658_v61  ;;  %vm2593_vm6 = vcmask 1047559  }
 0x30c   :  { %v2099_v56 = vsel %vm2084_vm7, %v2039_v7, %v2659_v8  ;;  %v2137_v23 = vpack.c.bf16 %v2098_v34, %v1987_v41  ;;  %v4225_v7 = vld [vmem:[%s4259_s5] ss:$0 sm:$0xff]  ;;  %s3072_s5 = smov [#allocation8]  }
 0x30d   :  { %v2138_v18 = vpack.c.bf16 %v2099_v56, %v1988_v19  ;;  %s2603_s14 = sshll.u32 %s3072_s5, 4  ;;  %s2604_s14 = int_to_ptr.vmem [resolvable:$true] %s2603_s14 }
 0x30e   :  { %s3026_s15 = scalar_lea.vmem %s2604_s14, 128  ;;  %p3031_p3 = scmp.lt.s32.totalorder %s2604_s14, %s2604_s14 }
 0x30f   :  { %2356 = vmatprep.mubr.bf16.mxu0 %v2138_v18  ;;  %p3027_p2 = scmp.ne.s32.totalorder %s2604_s14, %s3026_s15  ;;  %p3032_p4 = scmp.lt.s32.totalorder %s3026_s15, %s3026_s15 }
 0x310   :  { %2357 = vmatmul.mubr.bf16.gmra.mrb[36].mxu0 %v2137_v23 }
 0x311   :  { %p3033_p5 = por %p3032_p4, %p3031_p3 }
 0x312   :  { %v2127_v25 = vld [vmem:[#allocation2 + $0xb8] sm:$0xff] }
 0x313   :  { %v2139_v21 = vpack.c.bf16 %v2127_v25, %v2124_v26  ;;  %p3034_p6 = pnand %p3033_p5, %p3027_p2 }
 0x315   :  { %2859 = vmatmul.mubr.msk.bf16.gmra.mrb[44].mxu1 %vm1325_vm15, %v2139_v21 }
 0x320   :  { %v2740_v12 = vpop.f32.mrb[24].mxu0 }
 0x321   :  { %v2741_v11 = vpop.f32.mrb[25].mxu0 }
 0x322   :  { %v2742_v2 = vadd.f32 %v2741_v11, %v2740_v12  ;;  %v2743_v29 = vpop.f32.mrb[26].mxu0 }
 0x323   :  { %v2744_v14 = vpop.f32.mrb[27].mxu0 }
 0x324   :  { %v2745_v22 = vadd.f32 %v2744_v14, %v2743_v29 }
 0x328   :  { %v2746_v46 = vpop.f32.mrb[28].mxu0 }
 0x329   :  { %v2747_v59 = vpop.f32.mrb[29].mxu0 }
 0x32a   :  { %v2748_v17 = vadd.f32 %v2747_v59, %v2746_v46  ;;  %v2749_v36 = vpop.f32.mrb[30].mxu0 }
 0x32b   :  { %v2750_v37 = vpop.f32.mrb[31].mxu0 }
 0x32c   :  { %v2751_v38 = vadd.f32 %v2750_v37, %v2749_v36 }
 0x32e   :  { %v2856_v39 = vpop.f32.mrb[40].mxu1 }
 0x32f   :  { %v2408_v40 = vadd.f32 %v2856_v39, %v2748_v17  ;;  %v2399_v49 = vpop.f32.mrb[41].mxu1 }
 0x330   :  { %v2400_v5 = vadd.f32 %v2742_v2, %v2399_v49  ;;  %v2857_v31 = vpop.f32.mrb[42].mxu1 }
 0x331   :  { %v2433_v47 = vmul.f32 %v4216_v33, %v2408_v40  ;;  %v2411_v44 = vadd.f32 %v2857_v31, %v2751_v38  ;;  %v2402_v45 = vpop.f32.mrb[43].mxu1 }
 0x332   :  { %v2431_v28 = vmul.f32 %v4216_v33, %v2400_v5  ;;  %v2403_v32 = vadd.f32 %v2745_v22, %v2402_v45 }
 0x333   :  { %v2451_v20 = vrot.slane %v2433_v47, 4  ;;  %v2434_v50 = vmul.f32 %v4216_v33, %v2411_v44 }
 0x334   :  { %v2439_v51 = vrot.slane %v2431_v28, 4  ;;  %v2432_v52 = vmul.f32 %v4216_v33, %v2403_v32 }
 0x335   :  { %v2452_v55 = vadd.f32 %v2451_v20, %v2433_v47  ;;  %v2457_v42 = vrot.slane %v2434_v50, 4 }
 0x336   :  { %v2440_v13 = vadd.f32 %v2439_v51, %v2431_v28  ;;  %v2445_v57 = vrot.slane %v2432_v52, 4 }
 0x337   :  { %v2453_v41 = vrot.slane %v2452_v55, 2  ;;  %v2458_v19 = vadd.f32 %v2457_v42, %v2434_v50 }
 0x338   :  { %v2441_v58 = vrot.slane %v2440_v13, 2  ;;  %v2446_v48 = vadd.f32 %v2445_v57, %v2432_v52 }
 0x339   :  { %v2454_v60 = vadd.f32 %v2453_v41, %v2452_v55  ;;  %v2459_v62 = vrot.slane %v2458_v19, 2 }
 0x33a   :  { %v2442_v35 = vadd.f32 %v2441_v58, %v2440_v13  ;;  %v2447_v4 = vrot.slane %v2446_v48, 2 }
 0x33b   :  { %v2455_v0 = vrot.slane %v2454_v60, 1  ;;  %v2460_v53 = vadd.f32 %v2459_v62, %v2458_v19 }
 0x33c   :  { %v2443_v16 = vrot.slane %v2442_v35, 1  ;;  %v2448_v1 = vadd.f32 %v2447_v4, %v2446_v48 }
 0x33d   :  { %v2456_v10 = vadd.f32 %v2455_v0, %v2454_v60  ;;  %v2461_v30 = vrot.slane %v2460_v53, 1 }
 0x33e   :  { %v2444_v15 = vadd.f32 %v2443_v16, %v2442_v35  ;;  %v2449_v63 = vrot.slane %v2448_v1, 1 }
 0x33f   :  { %v2496_v9 = vadd.f32 %v4225_v7, %v2456_v10  ;;  %v2462_v24 = vadd.f32 %v2461_v30, %v2460_v53 }
 0x340   :  { %v2494_v43 = vadd.f32 %v4225_v7, %v2444_v15  ;;  %v2450_v6 = vadd.f32 %v2449_v63, %v2448_v1 }
 0x341   :  { %v2504_v27 = vadd.f32 0.1, %v2496_v9  ;;  %v2497_v54 = vadd.f32 %v4225_v7, %v2462_v24 }
 0x342   :  { %v2502_v61 = vadd.f32 0.1, %v2494_v43  ;;  %v2495_v3 = vadd.f32 %v4225_v7, %v2450_v6 }
 0x343   :  { %v2520_v8 = vmin.f32 %v2504_v27, 0.0  ;;  %v2505_v34 = vadd.f32 0.1, %v2497_v54  ;;  %vm2512_vm15 = vcmp.gt.f32.partialorder %v2504_v27, 0.0 }
 0x344   :  { %v2518_v56 = vmin.f32 %v2502_v61, 0.0  ;;  %v2503_v23 = vadd.f32 0.1, %v2495_v3  ;;  %vm2510_vm8 = vcmp.gt.f32.partialorder %v2502_v61, 0.0 }
 0x345   :  { %v2530_v18 = vmul.f32 1.442695, %v2520_v8  ;;  %v2521_v26 = vmin.f32 %v2505_v34, 0.0  ;;  %vm2513_vm9 = vcmp.gt.f32.partialorder %v2505_v34, 0.0 }
 0x346   :  { %v2526_v25 = vmul.f32 1.442695, %v2518_v56  ;;  %v2519_v21 = vmin.f32 %v2503_v23, 0.0  ;;  %vm2511_vm10 = vcmp.gt.f32.partialorder %v2503_v23, 0.0 }
 0x347   :  { %2965 = vpow2.f32 %v2530_v18  ;;  %v2532_v12 = vmul.f32 1.442695, %v2521_v26 }
 0x348   :  { %2967 = vpow2.f32 %v2526_v25  ;;  %v2528_v11 = vmul.f32 1.442695, %v2519_v21 }
 0x349   :  { %2969 = vpow2.f32 %v2532_v12 }
 0x34a   :  { %2971 = vpow2.f32 %v2528_v11 }
 0x351   :  { %v2966_v2 = vpop.eup %2965 }
 0x352   :  { %v2968_v29 = vpop.eup %2967  ;;  %v2686_v14 = vadd.f32 -1.0, %v2966_v2 }
 0x353   :  { %v2970_v22 = vpop.eup %2969  ;;  %v2684_v46 = vadd.f32 -1.0, %v2968_v29 }
 0x354   :  { %v2972_v59 = vpop.eup %2971  ;;  %v2552_v17 = vsel %vm2512_vm15, %v2504_v27, %v2686_v14  ;;  %v2687_v36 = vadd.f32 -1.0, %v2970_v22 }
 0x355   :  { %v2560_v37 = vadd.f32 1.0, %v2552_v17  ;;  %v2550_v38 = vsel %vm2510_vm8, %v2502_v61, %v2684_v46  ;;  %v2685_v39 = vadd.f32 -1.0, %v2972_v59 }
 0x356   :  { %v2553_v40 = vsel %vm2513_vm9, %v2505_v34, %v2687_v36  ;;  %v2558_v31 = vadd.f32 1.0, %v2550_v38 }
 0x357   :  { %v2551_v49 = vsel %vm2511_vm10, %v2503_v23, %v2685_v39  ;;  %v2561_v5 = vadd.f32 1.0, %v2553_v40  ;;  %v2577_v44 = vrot.slane %v2560_v37, 6 }
 0x358   :  { %v2559_v47 = vadd.f32 1.0, %v2551_v49 }
 0x359   :  { %v2580_v28 = vrot.slane %v2561_v5, 5 }
 0x35a   :  { %v2574_v45 = vrot.slane %v2559_v47, 7 }
 0x35c   :  { %v2576_v32 = vsel %vm2575_vm11, %v2574_v45, %v2558_v31 }
 0x35d   :  { %v2579_v20 = vsel %vm2578_vm12, %v2577_v44, %v2576_v32 }
 0x35e   :  { %v4231_v50 = vsel %vm2581_vm13, %v2580_v28, %v2579_v20 }
 0x383   :  { %v2752_v51 = vpop.f32.mrb[32].mxu0 }
 0x384   :  { %v2753_v52 = vpop.f32.mrb[33].mxu0 }
 0x385   :  { %v2754_v55 = vadd.f32 %v2753_v52, %v2752_v51  ;;  %v2755_v42 = vpop.f32.mrb[34].mxu0 }
 0x386   :  { %v2756_v13 = vpop.f32.mrb[35].mxu0 }
 0x387   :  { %v2757_v57 = vadd.f32 %v2756_v13, %v2755_v42 }
 0x3e3   :  { %v2758_v41 = vpop.f32.mrb[36].mxu0 }
 0x3e4   :  { %v2759_v19 = vpop.f32.mrb[37].mxu0 }
 0x3e5   :  { %v2760_v58 = vadd.f32 %v2759_v19, %v2758_v41  ;;  %v2761_v48 = vpop.f32.mrb[38].mxu0 }
 0x3e6   :  { %v2762_v60 = vpop.f32.mrb[39].mxu0 }
 0x3e7   :  { %v2763_v62 = vadd.f32 %v2762_v60, %v2761_v48 }
 0x3e8   :  { %v2860_v35 = vpop.f32.mrb[44].mxu1 }
 0x3e9   :  { %v2415_v4 = vpop.f32.mrb[45].mxu1  ;;  %v2424_v0 = vadd.f32 %v2860_v35, %v2760_v58 }
 0x3ea   :  { %v2416_v53 = vadd.f32 %v2754_v55, %v2415_v4  ;;  %v2861_v16 = vpop.f32.mrb[46].mxu1 }
 0x3eb   :  { %v2418_v1 = vpop.f32.mrb[47].mxu1  ;;  %v2437_v10 = vmul.f32 %v4216_v33, %v2424_v0  ;;  %v2427_v30 = vadd.f32 %v2861_v16, %v2763_v62 }
 0x3ec   :  { %v2435_v15 = vmul.f32 %v4216_v33, %v2416_v53  ;;  %v2419_v63 = vadd.f32 %v2757_v57, %v2418_v1 }
 0x3ed   :  { %v2475_v9 = vrot.slane %v2437_v10, 4  ;;  %v2438_v24 = vmul.f32 %v4216_v33, %v2427_v30 }
 0x3ee   :  { %v2463_v43 = vrot.slane %v2435_v15, 4  ;;  %v2436_v6 = vmul.f32 %v4216_v33, %v2419_v63 }
 0x3ef   :  { %v2476_v27 = vadd.f32 %v2475_v9, %v2437_v10  ;;  %v2481_v54 = vrot.slane %v2438_v24, 4 }
 0x3f0   :  { %v2464_v61 = vadd.f32 %v2463_v43, %v2435_v15  ;;  %v2469_v3 = vrot.slane %v2436_v6, 4 }
 0x3f1   :  { %v2477_v8 = vrot.slane %v2476_v27, 2  ;;  %v2482_v34 = vadd.f32 %v2481_v54, %v2438_v24 }
 0x3f2   :  { %v2465_v56 = vrot.slane %v2464_v61, 2  ;;  %v2470_v23 = vadd.f32 %v2469_v3, %v2436_v6 }
 0x3f3   :  { %v2478_v18 = vadd.f32 %v2477_v8, %v2476_v27  ;;  %v2483_v26 = vrot.slane %v2482_v34, 2 }
 0x3f4   :  { %v2466_v25 = vadd.f32 %v2465_v56, %v2464_v61  ;;  %v2471_v21 = vrot.slane %v2470_v23, 2 }
 0x3f5   :  { %v2479_v12 = vrot.slane %v2478_v18, 1  ;;  %v2484_v11 = vadd.f32 %v2483_v26, %v2482_v34 }
 0x3f6   :  { %v2467_v2 = vrot.slane %v2466_v25, 1  ;;  %v2472_v29 = vadd.f32 %v2471_v21, %v2470_v23 }
 0x3f7   :  { %v2480_v14 = vadd.f32 %v2479_v12, %v2478_v18  ;;  %v2485_v22 = vrot.slane %v2484_v11, 1 }
 0x3f8   :  { %v2468_v46 = vadd.f32 %v2467_v2, %v2466_v25  ;;  %v2473_v33 = vrot.slane %v2472_v29, 1 }
 0x3f9   :  { %v2500_v59 = vadd.f32 %v4225_v7, %v2480_v14  ;;  %v2486_v17 = vadd.f32 %v2485_v22, %v2484_v11 }
 0x3fa   :  { %v2498_v36 = vadd.f32 %v4225_v7, %v2468_v46  ;;  %v2474_v37 = vadd.f32 %v2473_v33, %v2472_v29 }
 0x3fb   :  { %v2508_v38 = vadd.f32 0.1, %v2500_v59  ;;  %v2501_v39 = vadd.f32 %v4225_v7, %v2486_v17 }
 0x3fc   :  { %v2506_v40 = vadd.f32 0.1, %v2498_v36  ;;  %v2499_v49 = vadd.f32 %v4225_v7, %v2474_v37 }
 0x3fd   :  { %v2524_v5 = vmin.f32 %v2508_v38, 0.0  ;;  %v2509_v31 = vadd.f32 0.1, %v2501_v39  ;;  %vm2516_vm14 = vcmp.gt.f32.partialorder %v2508_v38, 0.0 }
 0x3fe   :  { %v2522_v47 = vmin.f32 %v2506_v40, 0.0  ;;  %v2507_v44 = vadd.f32 0.1, %v2499_v49  ;;  %vm2514_vm0 = vcmp.gt.f32.partialorder %v2506_v40, 0.0 }
 0x3ff   :  { %v2525_v45 = vmin.f32 %v2509_v31, 0.0  ;;  %v2538_v28 = vmul.f32 1.442695, %v2524_v5  ;;  %vm2517_vm1 = vcmp.gt.f32.partialorder %v2509_v31, 0.0 }
 0x400   :  { %v2534_v32 = vmul.f32 1.442695, %v2522_v47  ;;  %v2523_v20 = vmin.f32 %v2507_v44, 0.0  ;;  %vm2515_vm2 = vcmp.gt.f32.partialorder %v2507_v44, 0.0 }
 0x401   :  { %2973 = vpow2.f32 %v2538_v28  ;;  %v2540_v51 = vmul.f32 1.442695, %v2525_v45 }
 0x402   :  { %2975 = vpow2.f32 %v2534_v32  ;;  %v2536_v52 = vmul.f32 1.442695, %v2523_v20 }
 0x403   :  { %2977 = vpow2.f32 %v2540_v51 }
 0x404   :  { %2979 = vpow2.f32 %v2536_v52 }
 0x40b   :  { %v2974_v55 = vpop.eup %2973 }
 0x40c   :  { %v2976_v42 = vpop.eup %2975  ;;  %v2690_v13 = vadd.f32 -1.0, %v2974_v55 }
 0x40d   :  { %v2978_v57 = vpop.eup %2977  ;;  %v2688_v7 = vadd.f32 -1.0, %v2976_v42 }
 0x40e   :  { %v2980_v41 = vpop.eup %2979  ;;  %v2691_v19 = vadd.f32 -1.0, %v2978_v57  ;;  %v2556_v58 = vsel %vm2516_vm14, %v2508_v38, %v2690_v13 }
 0x40f   :  { %v2689_v48 = vadd.f32 -1.0, %v2980_v41  ;;  %v2554_v60 = vsel %vm2514_vm0, %v2506_v40, %v2688_v7  ;;  %v2564_v0 = vadd.f32 1.0, %v2556_v58 }
 0x410   :  { %v2557_v62 = vsel %vm2517_vm1, %v2509_v31, %v2691_v19  ;;  %v2562_v35 = vadd.f32 1.0, %v2554_v60 }
 0x411   :  { %v2555_v4 = vsel %vm2515_vm2, %v2507_v44, %v2689_v48  ;;  %v2565_v16 = vadd.f32 1.0, %v2557_v62  ;;  %v2589_v15 = vrot.slane %v2564_v0, 2 }
 0x412   :  { %v2563_v53 = vadd.f32 1.0, %v2555_v4  ;;  %v2583_v1 = vrot.slane %v2562_v35, 4 }
 0x413   :  { %v2592_v9 = vrot.slane %v2565_v16, 1 }
 0x414   :  { %v2585_v10 = vsel %vm2584_vm3, %v2583_v1, %v4231_v50  ;;  %v2586_v30 = vrot.slane %v2563_v53, 3 }
 0x416   :  { %v2588_v63 = vsel %vm2587_vm4, %v2586_v30, %v2585_v10 }
 0x417   :  { %v2591_v24 = vsel %vm2590_vm5, %v2589_v15, %v2588_v63 }
 0x418   :  { %v2594_v43 = vsel %vm2593_vm6, %v2592_v9, %v2591_v24 }
 0x419   :  { %2596 = vst [vmem:[#allocation8] sm:$0xff] %v2594_v43 }
 0x41a   :  { %3037 = shalt.err (!%p3034_p6)
}
 0x41b   :  { %s3038_s18 = scalar_lea.hbm %s4260_s6, 128 }
 0x41c   :  { %p3039_p7 = scmp.ne.s32.totalorder %s4260_s6, %s3038_s18  ;;  %p3042_p8 = scmp.lt.u32.totalorder %s3038_s18, %s4260_s6 }
 0x41e   :  { %p3044_p9 = pnand %p3042_p8, %p3039_p7 }
 0x420   :  { %3047 = shalt.err (!%p3044_p9)
}
 0x421   :  { %2606 = dma.vmem_to_hbm [thread:$0]  %s2604_s14, 128, %s4260_s6, [#allocation5]  }
 0x422   :  { %3052 = dma.done.wait [#allocation5], 128  }
 0x423   :  { %3053 = vsyncadd [#allocation5], 4294967168 }
 0x424   :  { %2610 = vsyncpa [#allocation4], 1 }
 0x425   :  { %2611 = vsyncpa [#allocation7], 1 }
 0x426   :  { %2612 = vsyncpa [#allocation5], 1 }

</bundles_post_ra>
